<compile_context>
chip_gen: v6e
topology: v6e:2x2x1
jax: 0.10.0
libtpu: 0.0.40
codegen_flags: <defaults>
</compile_context>

<pallas_src>
import functools

import jax
import jax.numpy as jnp
from jax.experimental import pallas as pl
from jax.experimental.pallas import tpu as pltpu


# ---------------------------------------------------------------------------
# Kernel
# ---------------------------------------------------------------------------
def _vq_kernel(x_ref, cb_ref, cb_sq_ref, q_ref, out2_ref, *, emit_encodings):
    """One grid step: a tile of TN input vectors against the full codebook.

    x_ref     : (TN, D) f32  flattened input tile
    cb_ref    : (K,  D) f32  full codebook (grid-invariant)
    cb_sq_ref : (1,  K) f32  precomputed ||e_k||^2 (grid-invariant)
    q_ref     : (TN, D) f32  quantized output tile
    out2_ref  : (TN, K) f32  one-hot encodings tile      (emit_encodings=True)
                (TN, 1) i32  argmin indices tile         (emit_encodings=False)
    """
    x = x_ref[...]                       # (TN, D)
    cb = cb_ref[...]                     # (K, D)

    # x @ cb^T on the MXU with f32 accumulation.
    xe = jax.lax.dot_general(
        x, cb, (((1,), (1,)), ((), ())),
        preferred_element_type=jnp.float32)                      # (TN, K)

    # Euclidean distance modulo the per-row constant ||x||^2, which cannot
    # change the argmin over the codebook axis -> identical indices.
    dist = cb_sq_ref[...] - 2.0 * xe                             # (TN, K)

    # First-occurrence argmin over the codebook axis (as torch.argmin).
    # keepdims keeps it 2-D so no (TN,) relayout before the broadcast compare.
    idx = jnp.argmin(dist, axis=1, keepdims=True).astype(jnp.int32)   # (TN, 1)

    # One-hot encodings (matches torch scatter_ of ones into zeros).
    col = jax.lax.broadcasted_iota(jnp.int32, dist.shape, 1)
    enc = (col == idx).astype(jnp.float32)                       # (TN, K)

    # quantized = encodings @ codebook (exact row selection in f32, MXU).
    q_ref[...] = jnp.dot(enc, cb, preferred_element_type=jnp.float32)

    if emit_encodings:
        out2_ref[...] = enc
    else:
        out2_ref[...] = idx


# ---------------------------------------------------------------------------
# VMEM budgeting / tile selection
# ---------------------------------------------------------------------------
_SWEET_SPOT_ROWS = 2048     # memory-bound kernels saturate HBM BW by ~512-2048 rows
_MIN_TILE_ROWS = 256
_DEFAULT_VMEM_CAPACITY = 64 * 1024 * 1024   # conservative fallback (v7x per-TC)


def _vmem_budget_bytes():
    """Generation-aware VMEM budget; also used as vmem_limit_bytes."""
    try:
        cap = int(pltpu.get_tpu_info().vmem_capacity_bytes)
    except Exception:
        cap = _DEFAULT_VMEM_CAPACITY
    # Use at most half of physical VMEM, clamp to [16 MiB, 64 MiB].
    return max(16 * 1024 * 1024, min(cap // 2, 64 * 1024 * 1024))


def _vmem_bytes(t, k, d, emit_encodings):
    """Estimated VMEM footprint for a tile of t rows, including temporaries."""
    f32 = 4
    blocks = 2 * t * d * f32                                    # x in, 2 bufs
    blocks += 2 * t * d * f32                                   # quantized out, 2 bufs
    blocks += (2 * t * k * f32) if emit_encodings else (2 * t * f32)
    blocks += 2 * (k * d + k) * f32                             # codebook + ||e||^2, 2 bufs
    temps = 4 * t * k * f32                                     # xe, dist, iota, one-hot
    temps += t * f32                                            # idx
    return blocks + temps + (1 << 20)                           # ~1 MiB internal slack


def _pick_tile_n(n, k, d, emit_encodings, vmem_budget_bytes):
    """Pick a row-tile size.

    - small N (<= sweet spot): one full-extent step (extra steps only add
      per-step overhead on single-TC v5e/v6e and are noise at this size).
    - large N: largest power-of-two tile <= sweet spot that divides n and fits
      the VMEM budget (temporaries included), then nudge the grid step count to
      an even number so v7x's two TensorCores stay balanced.
    """
    if n % 8 != 0:
        return n                     # single full-extent block (always legal)
    if n <= _SWEET_SPOT_ROWS and _vmem_bytes(n, k, d, emit_encodings) <= vmem_budget_bytes:
        return n
    tile = 8
    while (tile * 2 <= _SWEET_SPOT_ROWS and n % (tile * 2) == 0
           and _vmem_bytes(tile * 2, k, d, emit_encodings) <= vmem_budget_bytes):
        tile *= 2
    if (n // tile) % 2 == 1 and tile % 2 == 0 and tile // 2 >= _MIN_TILE_ROWS:
        tile //= 2                   # even step count for v7x megacore balance
    return tile


# ---------------------------------------------------------------------------
# Wrapper
# ---------------------------------------------------------------------------
@functools.partial(jax.jit, static_argnames=("tile_n", "return_encodings"))
def vector_quantizer_forward(inputs, codebook_weight, *, tile_n=None,
                             return_encodings=True):
    """inputs: (B, H, W, D) float32; codebook_weight: (K, D) float32.

    return_encodings=True  (default, matches the PyTorch module):
        returns (quantized (B,H,W,D) f32, encodings (B*H*W, K) f32 one-hot)
    return_encodings=False (lean path, ~3x less HBM traffic at K=128, D=32):
        returns (quantized (B,H,W,D) f32, indices (B*H*W,) int32)
    """
    in_shape = inputs.shape
    k, d = codebook_weight.shape
    flat = inputs.reshape(-1, d).astype(jnp.float32)
    cb = codebook_weight.astype(jnp.float32)
    n = flat.shape[0]

    vmem_budget = _vmem_budget_bytes()
    if tile_n is None:
        tile_n = _pick_tile_n(n, k, d, return_encodings, vmem_budget)
    assert n % tile_n == 0, "flattened row count must be divisible by tile_n"

    # Grid-invariant codebook norms, hoisted out of the per-step kernel body.
    cb_sq = jnp.sum(cb * cb, axis=1)[None, :]                    # (1, K)

    grid = (n // tile_n,)
    kernel = functools.partial(_vq_kernel, emit_encodings=return_encodings)

    if return_encodings:
        out2_shape = jax.ShapeDtypeStruct((n, k), jnp.float32)
        out2_spec = pl.BlockSpec((tile_n, k), lambda i: (i, 0))
    else:
        out2_shape = jax.ShapeDtypeStruct((n, 1), jnp.int32)
        out2_spec = pl.BlockSpec((tile_n, 1), lambda i: (i, 0))

    quantized_flat, out2 = pl.pallas_call(
        kernel,
        out_shape=(
            jax.ShapeDtypeStruct((n, d), jnp.float32),
            out2_shape,
        ),
        grid_spec=pltpu.PrefetchScalarGridSpec(
            num_scalar_prefetch=0,
            grid=grid,
            in_specs=[
                pl.BlockSpec((tile_n, d), lambda i: (i, 0)),     # input row tile
                pl.BlockSpec((k, d), lambda i: (0, 0)),          # full codebook
                pl.BlockSpec((1, k), lambda i: (0, 0)),          # codebook norms
            ],
            out_specs=[
                pl.BlockSpec((tile_n, d), lambda i: (i, 0)),     # quantized tile
                out2_spec,                                       # encodings / indices
            ],
        ),
        compiler_params=pltpu.CompilerParams(
            dimension_semantics=("parallel",),
            vmem_limit_bytes=vmem_budget),
    )(flat, cb, cb_sq)

    quantized = quantized_flat.reshape(in_shape)
    if return_encodings:
        return quantized, out2
    return quantized, out2[:, 0]


# ---------------------------------------------------------------------------
# Pure-JAX reference (literal PyTorch formula) for self-checking
# ---------------------------------------------------------------------------
def reference_forward(inputs, codebook_weight):
    k, d = codebook_weight.shape
    flat = inputs.reshape(-1, d)
    dist = (jnp.sum(flat ** 2, axis=1, keepdims=True)
            + jnp.sum(codebook_weight ** 2, axis=1)[None, :]
            - 2.0 * flat @ codebook_weight.T)
    idx = jnp.argmin(dist, axis=1)
    enc = jax.nn.one_hot(idx, k, dtype=jnp.float32)
    q = (enc @ codebook_weight).reshape(inputs.shape)
    return q, enc, idx


if __name__ == "__main__":
    # Module hyperparameters (synthetic, deterministic init).
    n_embeddings = 128     # K
    embedding_dim = 32     # D
    batch, height, width = 2, 16, 16   # N = 2*16*16 = 512

    key = jax.random.PRNGKey(0)
    k_in, k_cb = jax.random.split(key)

    # VectorQuantizer: codebook.weight.data.uniform_(-1/K, 1/K)
    codebook_weight = jax.random.uniform(
        k_cb, (n_embeddings, embedding_dim),
        minval=-1.0 / n_embeddings, maxval=1.0 / n_embeddings,
        dtype=jnp.float32)
    # channels-last layout: (B, H, W, D) so that reshape(-1, D) matches
    # PyTorch's inputs.view(-1, embedding_dim).
    x = jax.random.normal(k_in, (batch, height, width, embedding_dim),
                          dtype=jnp.float32)

    q_ref, enc_ref, idx_ref = reference_forward(x, codebook_weight)

    # 1) Default path: (quantized, encodings), matching the PyTorch module.
    quantized, encodings = vector_quantizer_forward(x, codebook_weight)
    jax.block_until_ready((quantized, encodings))
    assert quantized.shape == x.shape
    assert encodings.shape == (batch * height * width, n_embeddings)
    assert jnp.allclose(encodings, enc_ref)
    assert jnp.allclose(quantized, q_ref, atol=1e-5, rtol=1e-5)
    assert jnp.allclose(jnp.sum(encodings, axis=1), 1.0)

    # 2) Lean path: (quantized, indices) — cuts HBM traffic ~3x at K=128, D=32.
    q_lean, idx = vector_quantizer_forward(x, codebook_weight,
                                           return_encodings=False)
    jax.block_until_ready((q_lean, idx))
    assert idx.shape == (batch * height * width,)
    assert jnp.array_equal(idx, idx_ref.astype(jnp.int32))
    assert jnp.allclose(q_lean, q_ref, atol=1e-5, rtol=1e-5)

    # 3) Multi-step grid (exercise tiling) at the demo size.
    q_t, enc_t = vector_quantizer_forward(x, codebook_weight, tile_n=128)
    jax.block_until_ready((q_t, enc_t))
    assert jnp.allclose(enc_t, enc_ref)
    assert jnp.allclose(q_t, q_ref, atol=1e-5, rtol=1e-5)

    print("KERNEL_OK")
</pallas_src>

<mosaic_0001>
module attributes {stable_mosaic.version = 11 : i64} {
  func.func @_vq_kernel(%arg0: i32, %arg1: memref<512x32xf32, #tpu.memory_space<vmem>>, %arg2: memref<128x32xf32, #tpu.memory_space<vmem>>, %arg3: memref<1x128xf32, #tpu.memory_space<vmem>>, %arg4: memref<512x32xf32, #tpu.memory_space<vmem>>, %arg5: memref<512x128xf32, #tpu.memory_space<vmem>>) attributes {dimension_semantics = [#tpu.dimension_semantics<parallel>], iteration_bounds = array<i64: 1>, scalar_prefetch = 0 : i64, scratch_operands = 0 : i64, tpu.core_type = #tpu.core_type<tc>, window_params = [{transform_indices = @transform_0, window_bounds = array<i64: 512, 32>}, {pipeline_mode = #tpu.pipeline_mode<synchronous>, transform_indices = @transform_1, window_bounds = array<i64: 128, 32>}, {pipeline_mode = #tpu.pipeline_mode<synchronous>, transform_indices = @transform_2, window_bounds = array<i64: 1, 128>}, {transform_indices = @transform_3, window_bounds = array<i64: 512, 32>}, {transform_indices = @transform_4, window_bounds = array<i64: 512, 128>}]} {
    %c0 = arith.constant 0 : index
    %c0_0 = arith.constant 0 : index
    %0 = vector.load %arg1[%c0, %c0_0] : memref<512x32xf32, #tpu.memory_space<vmem>>, vector<512x32xf32>
    %c0_1 = arith.constant 0 : index
    %c0_2 = arith.constant 0 : index
    %1 = vector.load %arg2[%c0_1, %c0_2] : memref<128x32xf32, #tpu.memory_space<vmem>>, vector<128x32xf32>
    %cst = arith.constant dense<0.000000e+00> : vector<512x128xf32>
    %2 = tpu.matmul %0, %1, %cst {dimension_numbers = #tpu.dot_dimension_numbers<[1], [1], [0], [0], [0, 0, 1, 0], [], []>} : vector<512x32xf32>, vector<128x32xf32>, vector<512x128xf32> -> vector<512x128xf32>
    %c0_3 = arith.constant 0 : index
    %c0_4 = arith.constant 0 : index
    %3 = vector.load %arg3[%c0_3, %c0_4] : memref<1x128xf32, #tpu.memory_space<vmem>>, vector<1x128xf32>
    %cst_5 = arith.constant 2.000000e+00 : f32
    %4 = vector.broadcast %cst_5 : f32 to vector<512x128xf32>
    %5 = arith.mulf %4, %2 : vector<512x128xf32>
    %6 = vector.broadcast %3 : vector<1x128xf32> to vector<512x128xf32>
    %7 = arith.subf %6, %5 : vector<512x128xf32>
    %8 = tpu.reduce_index %7 {axis = 1 : i32, kind = #tpu.reduction_kind<arg_min>} : vector<512x128xf32> -> vector<512xi32>
    %9 = vector.shape_cast %8 : vector<512xi32> to vector<512x1xi32>
    %10 = tpu.iota {dimensions = array<i32: 1>} : vector<512x128xi32>
    %11 = vector.broadcast %9 : vector<512x1xi32> to vector<512x128xi32>
    %12 = arith.cmpi eq, %10, %11 : vector<512x128xi32>
    %13 = arith.extui %12 : vector<512x128xi1> to vector<512x128xi32>
    %14 = arith.sitofp %13 : vector<512x128xi32> to vector<512x128xf32>
    %cst_6 = arith.constant dense<0.000000e+00> : vector<512x32xf32>
    %15 = tpu.matmul %14, %1, %cst_6 {dimension_numbers = #tpu.dot_dimension_numbers<[1], [0], [0], [1], [0, 0, 1, 1], [], []>} : vector<512x128xf32>, vector<128x32xf32>, vector<512x32xf32> -> vector<512x32xf32>
    %c0_7 = arith.constant 0 : index
    %c0_8 = arith.constant 0 : index
    %16 = vector.load %arg4[%c0_7, %c0_8] : memref<512x32xf32, #tpu.memory_space<vmem>>, vector<512x32xf32>
    tpu.vector_store %arg4[%c0_7, %c0_8], %15 {strides = array<i32>} : memref<512x32xf32, #tpu.memory_space<vmem>>, vector<512x32xf32>,
    %c0_9 = arith.constant 0 : index
    %c0_10 = arith.constant 0 : index
    %17 = vector.load %arg5[%c0_9, %c0_10] : memref<512x128xf32, #tpu.memory_space<vmem>>, vector<512x128xf32>
    tpu.vector_store %arg5[%c0_9, %c0_10], %14 {strides = array<i32>} : memref<512x128xf32, #tpu.memory_space<vmem>>, vector<512x128xf32>,
    return
  }
  func.func @transform_0(%arg0: i32) -> (i32, i32) {
    %c0_i32 = arith.constant 0 : i32
    %c0_i32_0 = arith.constant 0 : i32
    return %arg0, %c0_i32 : i32, i32
  }
  func.func @transform_1(%arg0: i32) -> (i32, i32) {
    %c0_i32 = arith.constant 0 : i32
    %c0_i32_0 = arith.constant 0 : i32
    %c0_i32_1 = arith.constant 0 : i32
    return %c0_i32, %c0_i32_0 : i32, i32
  }
  func.func @transform_2(%arg0: i32) -> (i32, i32) {
    %c0_i32 = arith.constant 0 : i32
    %c0_i32_0 = arith.constant 0 : i32
    %c0_i32_1 = arith.constant 0 : i32
    return %c0_i32, %c0_i32_0 : i32, i32
  }
  func.func @transform_3(%arg0: i32) -> (i32, i32) {
    %c0_i32 = arith.constant 0 : i32
    %c0_i32_0 = arith.constant 0 : i32
    return %arg0, %c0_i32 : i32, i32
  }
  func.func @transform_4(%arg0: i32) -> (i32, i32) {
    %c0_i32 = arith.constant 0 : i32
    %c0_i32_0 = arith.constant 0 : i32
    return %arg0, %c0_i32 : i32, i32
  }
}

</mosaic_0001>

<bundles_post_ra>
// kernel: vector_quantizer_forward.1
= control target key start
LH: loop header
LB: loop body
LE: loop exit
PB: predicated region body
PF: predicated region fallthrough
CT: control target
= control target key end

     0   :  { %10 = vsyncpa [#allocation3], 0  ;;  %s2960_s0 = inlined_call_operand.hbm [shape: f32[512,32], index: 0, kind: input, shape index: {}]   ;;  %s2961_s1 = inlined_call_operand.vmem [shape: f32[128,32], index: 1, kind: input, shape index: {}]   ;;  %s2962_s2 = inlined_call_operand.vmem [shape: f32[1,128], index: 2, kind: input, shape index: {}]   ;;  %s2963_s3 = inlined_call_operand.hbm [shape: f32[512,32], index: 3, kind: output, shape index: {0}]   ;;  %s2964_s4 = inlined_call_operand.hbm [shape: f32[512,128], index: 4, kind: output, shape index: {1}]  }
   0x1   :  { %11 = vsyncpa [#allocation4], 0 }
   0x2   :  { %12 = vsyncpa [#allocation7], 0  ;;  %s2439_s15 = smov [#allocation2]  }
   0x3   :  { %s18_s16 = sshll.u32 %s2439_s15, 4  ;;  %s19_s16 = int_to_ptr.vmem [resolvable:$true] %s18_s16 }
   0x4   :  { %s2381_s17 = scalar_lea.vmem %s19_s16, 8192  ;;  %p2386_p1 = scmp.lt.s32.totalorder %s19_s16, %s19_s16 }
   0x5   :  { %p2382_p0 = scmp.ne.s32.totalorder %s19_s16, %s2381_s17  ;;  %p2387_p2 = scmp.lt.s32.totalorder %s2381_s17, %s2381_s17 }
   0x7   :  { %p2388_p3 = por %p2387_p2, %p2386_p1 }
   0x9   :  { %p2389_p4 = pnand %p2388_p3, %p2382_p0 }
   0xb   :  { %2392 = shalt.err (!%p2389_p4)
}
   0xc   :  { %s2440_s18 = smov 128   ;;  %s2441_s19 = smov 8  }
   0xd   :  { %24 = dma.hbm_to_vmem [thread:$0]  %s2960_s0, 8192, %s19_s16, [#allocation3], %s2440_s18, %s2440_s18, %s2441_s19  }
   0xe   :  { %2433 = dma.done.wait [#allocation3], 8192  }
   0xf   :  { %2434 = vsyncadd [#allocation3], 4294959104  ;;  %vm112_vm0 = vcmask 261120   ;;  %v111_v0 = vld [vmem:[%s2961_s1 + $0x78] sm:$0xff]  ;;  %v110_v1 = vld [vmem:[%s2961_s1 + $0x70] sm:$0xff] }
  0x10   :  { %2110 = vmatprep.subr.msk.mxu0 %vm112_vm0, %v111_v0  ;;  %2238 = vmatprep.subr.mxu1 %v111_v0  ;;  %v109_v2 = vld [vmem:[%s2961_s1 + $0x68] sm:$0xff]  ;;  %v32_v3 = vld [vmem:[#allocation2] sm:$0xff]  ;;  %v107_v5 = vld [vmem:[%s2961_s1 + $0x58] sm:$0xff] }
  0x11   :  { %2111 = vmatpush3.xpose.msk.msra.mxu0 %vm112_vm0, %v111_v0  ;;  %2239 = vmatpush3.msra.mxu1 %v111_v0  ;;  %v108_v4 = vld [vmem:[%s2961_s1 + $0x60] sm:$0xff]  ;;  %v106_v6 = vld [vmem:[%s2961_s1 + $0x50] sm:$0xff]  ;;  %v105_v7 = vld [vmem:[%s2961_s1 + $0x48] sm:$0xff] }
  0x12   :  { %2112 = vmatprep.subr.msk.mxu0 %vm112_vm0, %v110_v1  ;;  %2240 = vmatprep.subr.mxu1 %v110_v1  ;;  %v104_v8 = vld [vmem:[%s2961_s1 + $0x40] sm:$0xff]  ;;  %v103_v9 = vld [vmem:[%s2961_s1 + $0x38] sm:$0xff]  ;;  %v102_v10 = vld [vmem:[%s2961_s1 + $0x30] sm:$0xff] }
  0x13   :  { %2241 = vmatpush3.msra.mxu1 %v110_v1  ;;  %2142 = vmatprep.mubr.msk.f32.mxu0 %vm112_vm0, %v32_v3  ;;  %v101_v11 = vld [vmem:[%s2961_s1 + $0x28] sm:$0xff]  ;;  %v100_v12 = vld [vmem:[%s2961_s1 + $0x20] sm:$0xff]  ;;  %v99_v13 = vld [vmem:[%s2961_s1 + $0x18] sm:$0xff] }
  0x14   :  { %2242 = vmatprep.subr.mxu1 %v109_v2  ;;  %v98_v14 = vld [vmem:[%s2961_s1 + $0x10] sm:$0xff]  ;;  %v97_v15 = vld [vmem:[%s2961_s1 + $0x8] sm:$0xff]  ;;  %v96_v16 = vld [vmem:[%s2961_s1] sm:$0xff] }
  0x15   :  { %2113 = vmatpush3.xpose.msk.msra.mxu0 %vm112_vm0, %v110_v1  ;;  %2243 = vmatpush3.msra.mxu1 %v109_v2  ;;  %v33_v17 = vld [vmem:[#allocation2 + $0x8] sm:$0xff]  ;;  %v34_v18 = vld [vmem:[#allocation2 + $0x10] sm:$0xff]  ;;  %v35_v19 = vld [vmem:[#allocation2 + $0x18] sm:$0xff] }
  0x16   :  { %2114 = vmatprep.subr.msk.mxu0 %vm112_vm0, %v109_v2  ;;  %2244 = vmatprep.subr.mxu1 %v108_v4  ;;  %v36_v20 = vld [vmem:[#allocation2 + $0x20] sm:$0xff]  ;;  %v37_v21 = vld [vmem:[#allocation2 + $0x28] sm:$0xff]  ;;  %v38_v22 = vld [vmem:[#allocation2 + $0x30] sm:$0xff] }
  0x17   :  { %2245 = vmatpush3.msra.mxu1 %v108_v4  ;;  %v39_v23 = vld [vmem:[#allocation2 + $0x38] sm:$0xff]  ;;  %v40_v24 = vld [vmem:[#allocation2 + $0x40] sm:$0xff]  ;;  %v41_v25 = vld [vmem:[#allocation2 + $0x48] sm:$0xff] }
  0x18   :  { %2246 = vmatprep.subr.mxu1 %v107_v5  ;;  %v42_v26 = vld [vmem:[#allocation2 + $0x50] sm:$0xff]  ;;  %v43_v27 = vld [vmem:[#allocation2 + $0x58] sm:$0xff]  ;;  %v44_v28 = vld [vmem:[#allocation2 + $0x60] sm:$0xff] }
  0x19   :  { %2115 = vmatpush3.xpose.msk.msra.mxu0 %vm112_vm0, %v109_v2  ;;  %2247 = vmatpush3.msra.mxu1 %v107_v5  ;;  %v45_v29 = vld [vmem:[#allocation2 + $0x68] sm:$0xff]  ;;  %v46_v30 = vld [vmem:[#allocation2 + $0x70] sm:$0xff]  ;;  %v47_v31 = vld [vmem:[#allocation2 + $0x78] sm:$0xff] }
  0x1a   :  { %2116 = vmatprep.subr.msk.mxu0 %vm112_vm0, %v108_v4  ;;  %2248 = vmatprep.subr.mxu1 %v106_v6  ;;  %v48_v32 = vld [vmem:[#allocation2 + $0x80] sm:$0xff]  ;;  %v49_v33 = vld [vmem:[#allocation2 + $0x88] sm:$0xff]  ;;  %v50_v34 = vld [vmem:[#allocation2 + $0x90] sm:$0xff] }
  0x1b   :  { %2249 = vmatpush3.msra.mxu1 %v106_v6  ;;  %v51_v35 = vld [vmem:[#allocation2 + $0x98] sm:$0xff]  ;;  %v52_v36 = vld [vmem:[#allocation2 + $0xa0] sm:$0xff]  ;;  %v53_v37 = vld [vmem:[#allocation2 + $0xa8] sm:$0xff] }
  0x1c   :  { %2250 = vmatprep.subr.mxu1 %v105_v7  ;;  %v54_v38 = vld [vmem:[#allocation2 + $0xb0] sm:$0xff]  ;;  %v55_v39 = vld [vmem:[#allocation2 + $0xb8] sm:$0xff]  ;;  %v56_v40 = vld [vmem:[#allocation2 + $0xc0] sm:$0xff] }
  0x1d   :  { %2117 = vmatpush3.xpose.msk.msra.mxu0 %vm112_vm0, %v108_v4  ;;  %2251 = vmatpush3.msra.mxu1 %v105_v7  ;;  %v57_v41 = vld [vmem:[#allocation2 + $0xc8] sm:$0xff]  ;;  %v58_v42 = vld [vmem:[#allocation2 + $0xd0] sm:$0xff]  ;;  %v59_v43 = vld [vmem:[#allocation2 + $0xd8] sm:$0xff] }
  0x1e   :  { %2118 = vmatprep.subr.msk.mxu0 %vm112_vm0, %v107_v5  ;;  %2252 = vmatprep.subr.mxu1 %v104_v8  ;;  %v60_v44 = vld [vmem:[#allocation2 + $0xe0] sm:$0xff]  ;;  %v61_v45 = vld [vmem:[#allocation2 + $0xe8] sm:$0xff]  ;;  %v62_v46 = vld [vmem:[#allocation2 + $0xf0] sm:$0xff] }
  0x1f   :  { %2253 = vmatpush3.msra.mxu1 %v104_v8  ;;  %v63_v47 = vld [vmem:[#allocation2 + $0xf8] sm:$0xff]  ;;  %v64_v48 = vld [vmem:[#allocation2 + $0x100] sm:$0xff]  ;;  %v65_v49 = vld [vmem:[#allocation2 + $0x108] sm:$0xff] }
  0x20   :  { %2254 = vmatprep.subr.mxu1 %v103_v9  ;;  %v66_v50 = vld [vmem:[#allocation2 + $0x110] sm:$0xff]  ;;  %v67_v51 = vld [vmem:[#allocation2 + $0x118] sm:$0xff]  ;;  %v68_v52 = vld [vmem:[#allocation2 + $0x120] sm:$0xff] }
  0x21   :  { %2119 = vmatpush3.xpose.msk.msra.mxu0 %vm112_vm0, %v107_v5  ;;  %2255 = vmatpush3.msra.mxu1 %v103_v9  ;;  %v69_v53 = vld [vmem:[#allocation2 + $0x128] sm:$0xff]  ;;  %v70_v54 = vld [vmem:[#allocation2 + $0x130] sm:$0xff]  ;;  %v71_v55 = vld [vmem:[#allocation2 + $0x138] sm:$0xff] }
  0x22   :  { %2120 = vmatprep.subr.msk.mxu0 %vm112_vm0, %v106_v6  ;;  %2256 = vmatprep.subr.mxu1 %v102_v10  ;;  %v72_v56 = vld [vmem:[#allocation2 + $0x140] sm:$0xff]  ;;  %v73_v57 = vld [vmem:[#allocation2 + $0x148] sm:$0xff]  ;;  %v74_v58 = vld [vmem:[#allocation2 + $0x150] sm:$0xff] }
  0x23   :  { %2257 = vmatpush3.msra.mxu1 %v102_v10  ;;  %v75_v59 = vld [vmem:[#allocation2 + $0x158] sm:$0xff]  ;;  %v76_v60 = vld [vmem:[#allocation2 + $0x160] sm:$0xff]  ;;  %v77_v61 = vld [vmem:[#allocation2 + $0x168] sm:$0xff] }
  0x24   :  { %2258 = vmatprep.subr.mxu1 %v101_v11  ;;  %v78_v62 = vld [vmem:[#allocation2 + $0x170] sm:$0xff]  ;;  %v79_v63 = vld [vmem:[#allocation2 + $0x178] sm:$0xff]  ;;  %v80_v0 = vld [vmem:[#allocation2 + $0x180] sm:$0xff] }
  0x25   :  { %2121 = vmatpush3.xpose.msk.msra.mxu0 %vm112_vm0, %v106_v6  ;;  %2259 = vmatpush3.msra.mxu1 %v101_v11  ;;  %v81_v1 = vld [vmem:[#allocation2 + $0x188] sm:$0xff]  ;;  %v82_v2 = vld [vmem:[#allocation2 + $0x190] sm:$0xff]  ;;  %v83_v3 = vld [vmem:[#allocation2 + $0x198] sm:$0xff] }
  0x26   :  { %2122 = vmatprep.subr.msk.mxu0 %vm112_vm0, %v105_v7  ;;  %2260 = vmatprep.subr.mxu1 %v100_v12  ;;  %v84_v4 = vld [vmem:[#allocation2 + $0x1a0] sm:$0xff]  ;;  %v85_v5 = vld [vmem:[#allocation2 + $0x1a8] sm:$0xff]  ;;  %v86_v6 = vld [vmem:[#allocation2 + $0x1b0] sm:$0xff] }
  0x27   :  { %2261 = vmatpush3.msra.mxu1 %v100_v12 }
  0x28   :  { %2262 = vmatprep.subr.mxu1 %v99_v13 }
  0x29   :  { %2123 = vmatpush3.xpose.msk.msra.mxu0 %vm112_vm0, %v105_v7  ;;  %2263 = vmatpush3.msra.mxu1 %v99_v13  ;;  %v87_v7 = vld [vmem:[#allocation2 + $0x1b8] sm:$0xff] }
  0x2a   :  { %2124 = vmatprep.subr.msk.mxu0 %vm112_vm0, %v104_v8  ;;  %2264 = vmatprep.subr.mxu1 %v98_v14 }
  0x2b   :  { %2265 = vmatpush3.msra.mxu1 %v98_v14 }
  0x2c   :  { %2266 = vmatprep.subr.mxu1 %v97_v15 }
  0x2d   :  { %2125 = vmatpush3.xpose.msk.msra.mxu0 %vm112_vm0, %v104_v8  ;;  %2267 = vmatpush3.msra.mxu1 %v97_v15  ;;  %v88_v8 = vld [vmem:[#allocation2 + $0x1c0] sm:$0xff] }
  0x2e   :  { %2126 = vmatprep.subr.msk.mxu0 %vm112_vm0, %v103_v9  ;;  %2268 = vmatprep.subr.mxu1 %v96_v16 }
  0x2f   :  { %2269 = vmatpush3.msra.mxu1 %v96_v16 }
  0x31   :  { %2127 = vmatpush3.xpose.msk.msra.mxu0 %vm112_vm0, %v103_v9  ;;  %v89_v9 = vld [vmem:[#allocation2 + $0x1c8] sm:$0xff] }
  0x32   :  { %2128 = vmatprep.subr.msk.mxu0 %vm112_vm0, %v102_v10 }
  0x35   :  { %2129 = vmatpush3.xpose.msk.msra.mxu0 %vm112_vm0, %v102_v10  ;;  %v90_v10 = vld [vmem:[#allocation2 + $0x1d0] sm:$0xff] }
  0x36   :  { %2130 = vmatprep.subr.msk.mxu0 %vm112_vm0, %v101_v11 }
  0x39   :  { %2131 = vmatpush3.xpose.msk.msra.mxu0 %vm112_vm0, %v101_v11  ;;  %v91_v11 = vld [vmem:[#allocation2 + $0x1d8] sm:$0xff] }
  0x3a   :  { %2132 = vmatprep.subr.msk.mxu0 %vm112_vm0, %v100_v12 }
  0x3d   :  { %2133 = vmatpush3.xpose.msk.msra.mxu0 %vm112_vm0, %v100_v12  ;;  %v92_v12 = vld [vmem:[#allocation2 + $0x1e0] sm:$0xff] }
  0x3e   :  { %2134 = vmatprep.subr.msk.mxu0 %vm112_vm0, %v99_v13 }
  0x41   :  { %2135 = vmatpush3.xpose.msk.msra.mxu0 %vm112_vm0, %v99_v13  ;;  %v93_v13 = vld [vmem:[#allocation2 + $0x1e8] sm:$0xff] }
  0x42   :  { %2136 = vmatprep.subr.msk.mxu0 %vm112_vm0, %v98_v14 }
  0x45   :  { %2137 = vmatpush3.xpose.msk.msra.mxu0 %vm112_vm0, %v98_v14  ;;  %v94_v14 = vld [vmem:[#allocation2 + $0x1f0] sm:$0xff] }
  0x46   :  { %2138 = vmatprep.subr.msk.mxu0 %vm112_vm0, %v97_v15 }
  0x49   :  { %2139 = vmatpush3.xpose.msk.msra.mxu0 %vm112_vm0, %v97_v15  ;;  %v95_v15 = vld [vmem:[#allocation2 + $0x1f8] sm:$0xff] }
  0x4a   :  { %2140 = vmatprep.subr.msk.mxu0 %vm112_vm0, %v96_v16 }
  0x4d   :  { %2141 = vmatpush3.xpose.msk.msra.mxu0 %vm112_vm0, %v96_v16 }
  0x50   :  { %2143 = vmatmul.mubr.msk.f32.vlgmr.msra.gmra.mxu0 %vm112_vm0, %v33_v17 }
  0x51   :  { %2145 = vmatprep.mubr.msk.f32.mxu0 %vm112_vm0, %v34_v18 }
  0x54   :  { %2146 = vmatmul.mubr.msk.f32.gmra.mxu0 %vm112_vm0, %v35_v19 }
  0x55   :  { %2148 = vmatprep.mubr.msk.f32.mxu0 %vm112_vm0, %v36_v20  ;;  %v2624_v20 = vld [vmem:[%s2962_s2] ss:$0 sm:$0xff]  ;;  %s2444_s2 = smov [#allocation6]  }
  0x56   :  { %s1725_s29 = sshll.u32 %s2444_s2, 4  ;;  %s1726_s29 = int_to_ptr.vmem [resolvable:$true] %s1725_s29 }
  0x57   :  { %s2393_s30 = scalar_lea.vmem %s1726_s29, 8192  ;;  %p2398_p6 = scmp.lt.s32.totalorder %s1726_s29, %s1726_s29 }
  0x58   :  { %2149 = vmatmul.mubr.msk.f32.gmra.mxu0 %vm112_vm0, %v37_v21  ;;  %p2394_p5 = scmp.ne.s32.totalorder %s1726_s29, %s2393_s30  ;;  %p2399_p7 = scmp.lt.s32.totalorder %s2393_s30, %s2393_s30 }
  0x59   :  { %2151 = vmatprep.mubr.msk.f32.mxu0 %vm112_vm0, %v38_v22 }
  0x5a   :  { %p2400_p8 = por %p2399_p7, %p2398_p6 }
  0x5c   :  { %2152 = vmatmul.mubr.msk.f32.gmra.mxu0 %vm112_vm0, %v39_v23  ;;  %p2401_p9 = pnand %p2400_p8, %p2394_p5 }
  0x5d   :  { %2154 = vmatprep.mubr.msk.f32.mxu0 %vm112_vm0, %v40_v24 }
  0x60   :  { %2155 = vmatmul.mubr.msk.f32.gmra.mxu0 %vm112_vm0, %v41_v25 }
  0x61   :  { %2157 = vmatprep.mubr.msk.f32.mxu0 %vm112_vm0, %v42_v26 }
  0x64   :  { %2158 = vmatmul.mubr.msk.f32.gmra.mxu0 %vm112_vm0, %v43_v27 }
  0x65   :  { %2160 = vmatprep.mubr.msk.f32.mxu0 %vm112_vm0, %v44_v28 }
  0x68   :  { %2161 = vmatmul.mubr.msk.f32.gmra.mxu0 %vm112_vm0, %v45_v29 }
  0x69   :  { %2163 = vmatprep.mubr.msk.f32.mxu0 %vm112_vm0, %v46_v30 }
  0x6c   :  { %2164 = vmatmul.mubr.msk.f32.gmra.mxu0 %vm112_vm0, %v47_v31 }
  0x6d   :  { %2166 = vmatprep.mubr.msk.f32.mxu0 %vm112_vm0, %v48_v32 }
  0x70   :  { %2167 = vmatmul.mubr.msk.f32.gmra.mxu0 %vm112_vm0, %v49_v33 }
  0x71   :  { %2169 = vmatprep.mubr.msk.f32.mxu0 %vm112_vm0, %v50_v34 }
  0x74   :  { %2170 = vmatmul.mubr.msk.f32.gmra.mxu0 %vm112_vm0, %v51_v35 }
  0x75   :  { %2172 = vmatprep.mubr.msk.f32.mxu0 %vm112_vm0, %v52_v36 }
  0x78   :  { %2173 = vmatmul.mubr.msk.f32.gmra.mxu0 %vm112_vm0, %v53_v37 }
  0x79   :  { %2175 = vmatprep.mubr.msk.f32.mxu0 %vm112_vm0, %v54_v38 }
  0x7c   :  { %2176 = vmatmul.mubr.msk.f32.gmra.mxu0 %vm112_vm0, %v55_v39 }
  0x7d   :  { %2178 = vmatprep.mubr.msk.f32.mxu0 %vm112_vm0, %v56_v40 }
  0x80   :  { %2179 = vmatmul.mubr.msk.f32.gmra.mxu0 %vm112_vm0, %v57_v41 }
  0x81   :  { %2181 = vmatprep.mubr.msk.f32.mxu0 %vm112_vm0, %v58_v42 }
  0x84   :  { %2182 = vmatmul.mubr.msk.f32.gmra.mxu0 %vm112_vm0, %v59_v43 }
  0x85   :  { %2184 = vmatprep.mubr.msk.f32.mxu0 %vm112_vm0, %v60_v44 }
  0x88   :  { %2185 = vmatmul.mubr.msk.f32.gmra.mxu0 %vm112_vm0, %v61_v45 }
  0x89   :  { %2187 = vmatprep.mubr.msk.f32.mxu0 %vm112_vm0, %v62_v46 }
  0x8c   :  { %2188 = vmatmul.mubr.msk.f32.gmra.mxu0 %vm112_vm0, %v63_v47 }
  0x8d   :  { %2190 = vmatprep.mubr.msk.f32.mxu0 %vm112_vm0, %v64_v48 }
  0x90   :  { %2191 = vmatmul.mubr.msk.f32.gmra.mxu0 %vm112_vm0, %v65_v49 }
  0x91   :  { %2193 = vmatprep.mubr.msk.f32.mxu0 %vm112_vm0, %v66_v50 }
  0x94   :  { %2194 = vmatmul.mubr.msk.f32.gmra.mxu0 %vm112_vm0, %v67_v51 }
  0x95   :  { %2196 = vmatprep.mubr.msk.f32.mxu0 %vm112_vm0, %v68_v52 }
  0x98   :  { %2197 = vmatmul.mubr.msk.f32.gmra.mxu0 %vm112_vm0, %v69_v53 }
  0x99   :  { %2199 = vmatprep.mubr.msk.f32.mxu0 %vm112_vm0, %v70_v54 }
  0x9c   :  { %2200 = vmatmul.mubr.msk.f32.gmra.mxu0 %vm112_vm0, %v71_v55 }
  0x9d   :  { %2202 = vmatprep.mubr.msk.f32.mxu0 %vm112_vm0, %v72_v56 }
  0xa0   :  { %2203 = vmatmul.mubr.msk.f32.gmra.mxu0 %vm112_vm0, %v73_v57 }
  0xa1   :  { %2205 = vmatprep.mubr.msk.f32.mxu0 %vm112_vm0, %v74_v58 }
  0xa4   :  { %2206 = vmatmul.mubr.msk.f32.gmra.mxu0 %vm112_vm0, %v75_v59 }
  0xa5   :  { %2208 = vmatprep.mubr.msk.f32.mxu0 %vm112_vm0, %v76_v60 }
  0xa8   :  { %2209 = vmatmul.mubr.msk.f32.gmra.mxu0 %vm112_vm0, %v77_v61 }
  0xa9   :  { %2211 = vmatprep.mubr.msk.f32.mxu0 %vm112_vm0, %v78_v62 }
  0xac   :  { %2212 = vmatmul.mubr.msk.f32.gmra.mxu0 %vm112_vm0, %v79_v63 }
  0xad   :  { %2214 = vmatprep.mubr.msk.f32.mxu0 %vm112_vm0, %v80_v0 }
  0xb0   :  { %2215 = vmatmul.mubr.msk.f32.gmra.mxu0 %vm112_vm0, %v81_v1 }
  0xb1   :  { %2217 = vmatprep.mubr.msk.f32.mxu0 %vm112_vm0, %v82_v2 }
  0xb4   :  { %2218 = vmatmul.mubr.msk.f32.gmra.mxu0 %vm112_vm0, %v83_v3 }
  0xb5   :  { %2220 = vmatprep.mubr.msk.f32.mxu0 %vm112_vm0, %v84_v4 }
  0xb8   :  { %2221 = vmatmul.mubr.msk.f32.gmra.mxu0 %vm112_vm0, %v85_v5 }
  0xb9   :  { %2223 = vmatprep.mubr.msk.f32.mxu0 %vm112_vm0, %v86_v6 }
  0xbc   :  { %2224 = vmatmul.mubr.msk.f32.gmra.mxu0 %vm112_vm0, %v87_v7 }
  0xbd   :  { %2226 = vmatprep.mubr.msk.f32.mxu0 %vm112_vm0, %v88_v8 }
  0xc0   :  { %2227 = vmatmul.mubr.msk.f32.gmra.mxu0 %vm112_vm0, %v89_v9 }
  0xc1   :  { %2229 = vmatprep.mubr.msk.f32.mxu0 %vm112_vm0, %v90_v10 }
  0xc4   :  { %2230 = vmatmul.mubr.msk.f32.gmra.mxu0 %vm112_vm0, %v91_v11 }
  0xc5   :  { %2232 = vmatprep.mubr.msk.f32.mxu0 %vm112_vm0, %v92_v12 }
  0xc8   :  { %2233 = vmatmul.mubr.msk.f32.gmra.mxu0 %vm112_vm0, %v93_v13 }
  0xc9   :  { %2235 = vmatprep.mubr.msk.f32.mxu0 %vm112_vm0, %v94_v14 }
  0xcc   :  { %2236 = vmatmul.mubr.msk.f32.gmra.mxu0 %vm112_vm0, %v95_v15 }
 0x110   :  { %v2144_v16 = vpop.f32.mrf.mxu0 }
 0x111   :  { %v740_v21 = vmul.f32 2.0, %v2144_v16 }
 0x112   :  { %v419_v17 = vpop.f32.mrf.mxu0 }
 0x113   :  { %v739_v18 = vmul.f32 2.0, %v419_v17  ;;  %v810_v27 = vsub.f32 %v2624_v20, %v740_v21 }
 0x114   :  { %v2147_v19 = vpop.f32.mrf.mxu0 }
 0x115   :  { %v809_v22 = vsub.f32 %v2624_v20, %v739_v18  ;;  %v742_v26 = vmul.f32 2.0, %v2147_v19 }
 0x116   :  { %v429_v23 = vpop.f32.mrf.mxu0 }
 0x117   :  { %v741_v24 = vmul.f32 2.0, %v429_v23  ;;  %873 = vmin.index.xlane.f32.xlu0 %v809_v22  ;;  %v812_v33 = vsub.f32 %v2624_v20, %v742_v26 }
 0x118   :  { %v2150_v25 = vpop.f32.mrf.mxu0 }
 0x119   :  { %v811_v28 = vsub.f32 %v2624_v20, %v741_v24  ;;  %v744_v32 = vmul.f32 2.0, %v2150_v25 }
 0x11a   :  { %v439_v29 = vpop.f32.mrf.mxu0 }
 0x11b   :  { %875 = vmin.index.xlane.f32.xlu0 %v810_v27  ;;  %877 = vmin.index.xlane.f32.xlu1 %v811_v28  ;;  %v743_v30 = vmul.f32 2.0, %v439_v29  ;;  %v814_v39 = vsub.f32 %v2624_v20, %v744_v32 }
 0x11c   :  { %v2153_v31 = vpop.f32.mrf.mxu0 }
 0x11d   :  { %v813_v34 = vsub.f32 %v2624_v20, %v743_v30  ;;  %v746_v38 = vmul.f32 2.0, %v2153_v31 }
 0x11e   :  { %v449_v35 = vpop.f32.mrf.mxu0 }
 0x11f   :  { %879 = vmin.index.xlane.f32.xlu1 %v812_v33  ;;  %v745_v36 = vmul.f32 2.0, %v449_v35  ;;  %881 = vmin.index.xlane.f32.xlu0 %v813_v34  ;;  %v816_v45 = vsub.f32 %v2624_v20, %v746_v38 }
 0x120   :  { %v2156_v37 = vpop.f32.mrf.mxu0 }
 0x121   :  { %v815_v40 = vsub.f32 %v2624_v20, %v745_v36  ;;  %v748_v44 = vmul.f32 2.0, %v2156_v37 }
 0x122   :  { %v459_v41 = vpop.f32.mrf.mxu0 }
 0x123   :  { %883 = vmin.index.xlane.f32.xlu1 %v814_v39  ;;  %v747_v42 = vmul.f32 2.0, %v459_v41  ;;  %885 = vmin.index.xlane.f32.xlu0 %v815_v40  ;;  %v818_v51 = vsub.f32 %v2624_v20, %v748_v44 }
 0x124   :  { %v2159_v43 = vpop.f32.mrf.mxu0 }
 0x125   :  { %v817_v46 = vsub.f32 %v2624_v20, %v747_v42  ;;  %v750_v50 = vmul.f32 2.0, %v2159_v43 }
 0x126   :  { %v469_v47 = vpop.f32.mrf.mxu0 }
 0x127   :  { %887 = vmin.index.xlane.f32.xlu1 %v816_v45  ;;  %v749_v48 = vmul.f32 2.0, %v469_v47  ;;  %889 = vmin.index.xlane.f32.xlu0 %v817_v46  ;;  %v820_v57 = vsub.f32 %v2624_v20, %v750_v50 }
 0x128   :  { %v2162_v49 = vpop.f32.mrf.mxu0 }
 0x129   :  { %v819_v52 = vsub.f32 %v2624_v20, %v749_v48  ;;  %v752_v56 = vmul.f32 2.0, %v2162_v49 }
 0x12a   :  { %v479_v53 = vpop.f32.mrf.mxu0 }
 0x12b   :  { %891 = vmin.index.xlane.f32.xlu1 %v818_v51  ;;  %v751_v54 = vmul.f32 2.0, %v479_v53  ;;  %893 = vmin.index.xlane.f32.xlu0 %v819_v52  ;;  %v822_v63 = vsub.f32 %v2624_v20, %v752_v56 }
 0x12c   :  { %v2165_v55 = vpop.f32.mrf.mxu0 }
 0x12d   :  { %v821_v58 = vsub.f32 %v2624_v20, %v751_v54  ;;  %v754_v62 = vmul.f32 2.0, %v2165_v55 }
 0x12e   :  { %v489_v59 = vpop.f32.mrf.mxu0 }
 0x12f   :  { %895 = vmin.index.xlane.f32.xlu1 %v820_v57  ;;  %v753_v60 = vmul.f32 2.0, %v489_v59  ;;  %897 = vmin.index.xlane.f32.xlu0 %v821_v58  ;;  %v824_v5 = vsub.f32 %v2624_v20, %v754_v62 }
 0x130   :  { %v2168_v61 = vpop.f32.mrf.mxu0 }
 0x131   :  { %v823_v0 = vsub.f32 %v2624_v20, %v753_v60  ;;  %v756_v4 = vmul.f32 2.0, %v2168_v61 }
 0x132   :  { %v499_v1 = vpop.f32.mrf.mxu0 }
 0x133   :  { %899 = vmin.index.xlane.f32.xlu1 %v822_v63  ;;  %v755_v2 = vmul.f32 2.0, %v499_v1  ;;  %901 = vmin.index.xlane.f32.xlu0 %v823_v0  ;;  %v826_v11 = vsub.f32 %v2624_v20, %v756_v4 }
 0x134   :  { %v2171_v3 = vpop.f32.mrf.mxu0 }
 0x135   :  { %v825_v6 = vsub.f32 %v2624_v20, %v755_v2  ;;  %v758_v10 = vmul.f32 2.0, %v2171_v3 }
 0x136   :  { %v509_v7 = vpop.f32.mrf.mxu0 }
 0x137   :  { %903 = vmin.index.xlane.f32.xlu1 %v824_v5  ;;  %v757_v8 = vmul.f32 2.0, %v509_v7  ;;  %905 = vmin.index.xlane.f32.xlu0 %v825_v6  ;;  %v828_v17 = vsub.f32 %v2624_v20, %v758_v10 }
 0x138   :  { %v2174_v9 = vpop.f32.mrf.mxu0 }
 0x139   :  { %v827_v12 = vsub.f32 %v2624_v20, %v757_v8  ;;  %v760_v16 = vmul.f32 2.0, %v2174_v9 }
 0x13a   :  { %v519_v13 = vpop.f32.mrf.mxu0 }
 0x13b   :  { %907 = vmin.index.xlane.f32.xlu1 %v826_v11  ;;  %v759_v14 = vmul.f32 2.0, %v519_v13  ;;  %909 = vmin.index.xlane.f32.xlu0 %v827_v12  ;;  %v830_v24 = vsub.f32 %v2624_v20, %v760_v16 }
 0x13c   :  { %v2177_v15 = vpop.f32.mrf.mxu0 }
 0x13d   :  { %v829_v18 = vsub.f32 %v2624_v20, %v759_v14  ;;  %v762_v23 = vmul.f32 2.0, %v2177_v15 }
 0x13e   :  { %v529_v19 = vpop.f32.mrf.mxu0 }
 0x13f   :  { %911 = vmin.index.xlane.f32.xlu1 %v828_v17  ;;  %v761_v21 = vmul.f32 2.0, %v529_v19  ;;  %913 = vmin.index.xlane.f32.xlu0 %v829_v18  ;;  %v832_v30 = vsub.f32 %v2624_v20, %v762_v23 }
 0x140   :  { %v2180_v22 = vpop.f32.mrf.mxu0 }
 0x141   :  { %v831_v25 = vsub.f32 %v2624_v20, %v761_v21  ;;  %v764_v29 = vmul.f32 2.0, %v2180_v22 }
 0x142   :  { %v539_v26 = vpop.f32.mrf.mxu0 }
 0x143   :  { %915 = vmin.index.xlane.f32.xlu1 %v830_v24  ;;  %v763_v27 = vmul.f32 2.0, %v539_v26  ;;  %917 = vmin.index.xlane.f32.xlu0 %v831_v25  ;;  %v834_v36 = vsub.f32 %v2624_v20, %v764_v29 }
 0x144   :  { %v2183_v28 = vpop.f32.mrf.mxu0 }
 0x145   :  { %v833_v31 = vsub.f32 %v2624_v20, %v763_v27  ;;  %v766_v35 = vmul.f32 2.0, %v2183_v28 }
 0x146   :  { %v549_v32 = vpop.f32.mrf.mxu0 }
 0x147   :  { %919 = vmin.index.xlane.f32.xlu1 %v832_v30  ;;  %v765_v33 = vmul.f32 2.0, %v549_v32  ;;  %921 = vmin.index.xlane.f32.xlu0 %v833_v31  ;;  %v836_v42 = vsub.f32 %v2624_v20, %v766_v35 }
 0x148   :  { %v2186_v34 = vpop.f32.mrf.mxu0 }
 0x149   :  { %v835_v37 = vsub.f32 %v2624_v20, %v765_v33  ;;  %v768_v41 = vmul.f32 2.0, %v2186_v34 }
 0x14a   :  { %v559_v38 = vpop.f32.mrf.mxu0 }
 0x14b   :  { %923 = vmin.index.xlane.f32.xlu1 %v834_v36  ;;  %v767_v39 = vmul.f32 2.0, %v559_v38  ;;  %925 = vmin.index.xlane.f32.xlu0 %v835_v37  ;;  %v838_v48 = vsub.f32 %v2624_v20, %v768_v41 }
 0x14c   :  { %v2189_v40 = vpop.f32.mrf.mxu0 }
 0x14d   :  { %v837_v43 = vsub.f32 %v2624_v20, %v767_v39  ;;  %v770_v47 = vmul.f32 2.0, %v2189_v40 }
 0x14e   :  { %v569_v44 = vpop.f32.mrf.mxu0 }
 0x14f   :  { %927 = vmin.index.xlane.f32.xlu1 %v836_v42  ;;  %v769_v45 = vmul.f32 2.0, %v569_v44  ;;  %929 = vmin.index.xlane.f32.xlu0 %v837_v43  ;;  %v840_v54 = vsub.f32 %v2624_v20, %v770_v47 }
 0x150   :  { %v2192_v46 = vpop.f32.mrf.mxu0 }
 0x151   :  { %v839_v49 = vsub.f32 %v2624_v20, %v769_v45  ;;  %v772_v53 = vmul.f32 2.0, %v2192_v46 }
 0x152   :  { %v579_v50 = vpop.f32.mrf.mxu0 }
 0x153   :  { %931 = vmin.index.xlane.f32.xlu1 %v838_v48  ;;  %v771_v51 = vmul.f32 2.0, %v579_v50  ;;  %933 = vmin.index.xlane.f32.xlu0 %v839_v49  ;;  %v842_v60 = vsub.f32 %v2624_v20, %v772_v53 }
 0x154   :  { %v2195_v52 = vpop.f32.mrf.mxu0 }
 0x155   :  { %v841_v55 = vsub.f32 %v2624_v20, %v771_v51  ;;  %v774_v59 = vmul.f32 2.0, %v2195_v52 }
 0x156   :  { %v589_v56 = vpop.f32.mrf.mxu0 }
 0x157   :  { %935 = vmin.index.xlane.f32.xlu1 %v840_v54  ;;  %v773_v57 = vmul.f32 2.0, %v589_v56  ;;  %937 = vmin.index.xlane.f32.xlu0 %v841_v55  ;;  %v844_v2 = vsub.f32 %v2624_v20, %v774_v59 }
 0x158   :  { %v2198_v58 = vpop.f32.mrf.mxu0 }
 0x159   :  { %v843_v61 = vsub.f32 %v2624_v20, %v773_v57  ;;  %v776_v1 = vmul.f32 2.0, %v2198_v58 }
 0x15a   :  { %v599_v62 = vpop.f32.mrf.mxu0 }
 0x15b   :  { %939 = vmin.index.xlane.f32.xlu1 %v842_v60  ;;  %v775_v63 = vmul.f32 2.0, %v599_v62  ;;  %941 = vmin.index.xlane.f32.xlu0 %v843_v61  ;;  %v846_v8 = vsub.f32 %v2624_v20, %v776_v1 }
 0x15c   :  { %v2201_v0 = vpop.f32.mrf.mxu0 }
 0x15d   :  { %v845_v3 = vsub.f32 %v2624_v20, %v775_v63  ;;  %v778_v7 = vmul.f32 2.0, %v2201_v0 }
 0x15e   :  { %v609_v4 = vpop.f32.mrf.mxu0 }
 0x15f   :  { %943 = vmin.index.xlane.f32.xlu1 %v844_v2  ;;  %v777_v5 = vmul.f32 2.0, %v609_v4  ;;  %945 = vmin.index.xlane.f32.xlu0 %v845_v3  ;;  %v848_v14 = vsub.f32 %v2624_v20, %v778_v7 }
 0x160   :  { %v2204_v6 = vpop.f32.mrf.mxu0 }
 0x161   :  { %v847_v9 = vsub.f32 %v2624_v20, %v777_v5  ;;  %v780_v13 = vmul.f32 2.0, %v2204_v6 }
 0x162   :  { %v619_v10 = vpop.f32.mrf.mxu0 }
 0x163   :  { %947 = vmin.index.xlane.f32.xlu1 %v846_v8  ;;  %v779_v11 = vmul.f32 2.0, %v619_v10  ;;  %949 = vmin.index.xlane.f32.xlu0 %v847_v9  ;;  %v850_v21 = vsub.f32 %v2624_v20, %v780_v13 }
 0x164   :  { %v2207_v12 = vpop.f32.mrf.mxu0 }
 0x165   :  { %v849_v15 = vsub.f32 %v2624_v20, %v779_v11  ;;  %v782_v19 = vmul.f32 2.0, %v2207_v12 }
 0x166   :  { %v629_v16 = vpop.f32.mrf.mxu0 }
 0x167   :  { %951 = vmin.index.xlane.f32.xlu1 %v848_v14  ;;  %v781_v17 = vmul.f32 2.0, %v629_v16  ;;  %953 = vmin.index.xlane.f32.xlu0 %v849_v15  ;;  %v852_v27 = vsub.f32 %v2624_v20, %v782_v19  ;;  %v1001_v19 = vlaneseq }
 0x168   :  { %v2210_v18 = vpop.f32.mrf.mxu0 }
 0x169   :  { %v851_v22 = vsub.f32 %v2624_v20, %v781_v17  ;;  %v784_v26 = vmul.f32 2.0, %v2210_v18 }
 0x16a   :  { %v639_v23 = vpop.f32.mrf.mxu0 }
 0x16b   :  { %955 = vmin.index.xlane.f32.xlu1 %v850_v21  ;;  %v783_v24 = vmul.f32 2.0, %v639_v23  ;;  %957 = vmin.index.xlane.f32.xlu0 %v851_v22  ;;  %v854_v33 = vsub.f32 %v2624_v20, %v784_v26  ;;  %v2690_v21 = vand.u32 127, %v1001_v19  ;;  %v2442_v23 = vmov 0.0  }
 0x16c   :  { %v2213_v25 = vpop.f32.mrf.mxu0 }
 0x16d   :  { %v853_v28 = vsub.f32 %v2624_v20, %v783_v24  ;;  %v786_v32 = vmul.f32 2.0, %v2213_v25  ;;  %v2443_v25 = vmov 1.0  }
 0x16e   :  { %v649_v29 = vpop.f32.mrf.mxu0 }
 0x16f   :  { %959 = vmin.index.xlane.f32.xlu1 %v852_v27  ;;  %v785_v30 = vmul.f32 2.0, %v649_v29  ;;  %961 = vmin.index.xlane.f32.xlu0 %v853_v28  ;;  %v856_v39 = vsub.f32 %v2624_v20, %v786_v32 }
 0x170   :  { %v2216_v31 = vpop.f32.mrf.mxu0 }
 0x171   :  { %v855_v34 = vsub.f32 %v2624_v20, %v785_v30  ;;  %v788_v38 = vmul.f32 2.0, %v2216_v31 }
 0x172   :  { %v659_v35 = vpop.f32.mrf.mxu0 }
 0x173   :  { %963 = vmin.index.xlane.f32.xlu1 %v854_v33  ;;  %v787_v36 = vmul.f32 2.0, %v659_v35  ;;  %965 = vmin.index.xlane.f32.xlu0 %v855_v34  ;;  %v858_v45 = vsub.f32 %v2624_v20, %v788_v38 }
 0x174   :  { %v2219_v37 = vpop.f32.mrf.mxu0 }
 0x175   :  { %v857_v40 = vsub.f32 %v2624_v20, %v787_v36  ;;  %v790_v44 = vmul.f32 2.0, %v2219_v37 }
 0x176   :  { %v669_v41 = vpop.f32.mrf.mxu0 }
 0x177   :  { %967 = vmin.index.xlane.f32.xlu1 %v856_v39  ;;  %v789_v42 = vmul.f32 2.0, %v669_v41  ;;  %969 = vmin.index.xlane.f32.xlu0 %v857_v40  ;;  %v860_v51 = vsub.f32 %v2624_v20, %v790_v44 }
 0x178   :  { %v2222_v43 = vpop.f32.mrf.mxu0 }
 0x179   :  { %v859_v46 = vsub.f32 %v2624_v20, %v789_v42  ;;  %v792_v50 = vmul.f32 2.0, %v2222_v43 }
 0x17a   :  { %v679_v47 = vpop.f32.mrf.mxu0 }
 0x17b   :  { %971 = vmin.index.xlane.f32.xlu1 %v858_v45  ;;  %v791_v48 = vmul.f32 2.0, %v679_v47  ;;  %973 = vmin.index.xlane.f32.xlu0 %v859_v46  ;;  %v862_v57 = vsub.f32 %v2624_v20, %v792_v50 }
 0x17c   :  { %v2225_v49 = vpop.f32.mrf.mxu0 }
 0x17d   :  { %v861_v52 = vsub.f32 %v2624_v20, %v791_v48  ;;  %v794_v56 = vmul.f32 2.0, %v2225_v49 }
 0x17e   :  { %v689_v53 = vpop.f32.mrf.mxu0 }
 0x17f   :  { %975 = vmin.index.xlane.f32.xlu1 %v860_v51  ;;  %v793_v54 = vmul.f32 2.0, %v689_v53  ;;  %977 = vmin.index.xlane.f32.xlu0 %v861_v52  ;;  %v864_v63 = vsub.f32 %v2624_v20, %v794_v56 }
 0x180   :  { %v2228_v55 = vpop.f32.mrf.mxu0 }
 0x181   :  { %v863_v58 = vsub.f32 %v2624_v20, %v793_v54  ;;  %v796_v62 = vmul.f32 2.0, %v2228_v55 }
 0x182   :  { %v699_v59 = vpop.f32.mrf.mxu0 }
 0x183   :  { %979 = vmin.index.xlane.f32.xlu1 %v862_v57  ;;  %v795_v60 = vmul.f32 2.0, %v699_v59  ;;  %981 = vmin.index.xlane.f32.xlu0 %v863_v58  ;;  %v866_v5 = vsub.f32 %v2624_v20, %v796_v62 }
 0x184   :  { %v2231_v61 = vpop.f32.mrf.mxu0 }
 0x185   :  { %v865_v0 = vsub.f32 %v2624_v20, %v795_v60  ;;  %v798_v4 = vmul.f32 2.0, %v2231_v61 }
 0x186   :  { %v709_v1 = vpop.f32.mrf.mxu0 }
 0x187   :  { %983 = vmin.index.xlane.f32.xlu1 %v864_v63  ;;  %v797_v2 = vmul.f32 2.0, %v709_v1  ;;  %985 = vmin.index.xlane.f32.xlu0 %v865_v0  ;;  %v868_v11 = vsub.f32 %v2624_v20, %v798_v4 }
 0x188   :  { %v2234_v3 = vpop.f32.mrf.mxu0 }
 0x189   :  { %v867_v6 = vsub.f32 %v2624_v20, %v797_v2  ;;  %v800_v10 = vmul.f32 2.0, %v2234_v3 }
 0x18a   :  { %v719_v7 = vpop.f32.mrf.mxu0 }
 0x18b   :  { %987 = vmin.index.xlane.f32.xlu1 %v866_v5  ;;  %v799_v8 = vmul.f32 2.0, %v719_v7  ;;  %989 = vmin.index.xlane.f32.xlu0 %v867_v6  ;;  %v870_v16 = vsub.f32 %v2624_v20, %v800_v10 }
 0x18c   :  { %v2237_v9 = vpop.f32.mrf.mxu0 }
 0x18d   :  { %v869_v12 = vsub.f32 %v2624_v20, %v799_v8  ;;  %v802_v15 = vmul.f32 2.0, %v2237_v9 }
 0x18e   :  { %v729_v13 = vpop.f32.mrf.mxu0 }
 0x18f   :  { %991 = vmin.index.xlane.f32.xlu1 %v868_v11  ;;  %v801_v14 = vmul.f32 2.0, %v729_v13  ;;  %993 = vmin.index.xlane.f32.xlu0 %v869_v12  ;;  %v872_v18 = vsub.f32 %v2624_v20, %v802_v15 }
 0x191   :  { %v871_v17 = vsub.f32 %v2624_v20, %v801_v14 }
 0x193   :  { %995 = vmin.index.xlane.f32.xlu1 %v870_v16  ;;  %997 = vmin.index.xlane.f32.xlu0 %v871_v17 }
 0x197   :  { %999 = vmin.index.xlane.f32.xlu1 %v872_v18 }
 0x1a0   :  { %v874_v22 = vpop.xlane.xlu0 %873 }
 0x1a1   :  { %vm1003_vm1 = vcmp.eq.s32.totalorder %v2690_v21, %v874_v22 }
 0x1a2   :  { %v1822_v24 = vsel %vm1003_vm1, 1.0, %v2442_v23  ;;  %2270 = vmatprep.mubr.msk.f32.mxu1 %vm1003_vm1, %v2443_v25 }
 0x1a3   :  { %1644 = vst [vmem:[#allocation6] sm:$0xff] %v1822_v24 }
 0x1a4   :  { %v876_v26 = vpop.xlane.xlu0 %875  ;;  %v878_v27 = vpop.xlane.xlu1 %877 }
 0x1a5   :  { %vm1004_vm2 = vcmp.eq.s32.totalorder %v2690_v21, %v876_v26  ;;  %vm1005_vm3 = vcmp.eq.s32.totalorder %v2690_v21, %v878_v27 }
 0x1a6   :  { %v1823_v20 = vsel %vm1004_vm2, 1.0, %v2442_v23  ;;  %v1824_v28 = vsel %vm1005_vm3, 1.0, %v2442_v23  ;;  %2271 = vmatmul.mubr.msk.f32.vlgmr.msra.gmra.mxu1 %vm1004_vm2, %v2443_v25 }
 0x1a7   :  { %1645 = vst [vmem:[#allocation6 + $0x8] sm:$0xff] %v1823_v20  ;;  %1646 = vst [vmem:[#allocation6 + $0x10] sm:$0xff] %v1824_v28  ;;  %2273 = vmatprep.mubr.msk.f32.mxu1 %vm1005_vm3, %v2443_v25 }
 0x1a8   :  { %v880_v29 = vpop.xlane.xlu1 %879  ;;  %v882_v30 = vpop.xlane.xlu0 %881 }
 0x1a9   :  { %vm1006_vm4 = vcmp.eq.s32.totalorder %v2690_v21, %v880_v29  ;;  %vm1007_vm5 = vcmp.eq.s32.totalorder %v2690_v21, %v882_v30 }
 0x1aa   :  { %v1825_v31 = vsel %vm1006_vm4, 1.0, %v2442_v23  ;;  %v1826_v32 = vsel %vm1007_vm5, 1.0, %v2442_v23  ;;  %2274 = vmatmul.mubr.msk.f32.gmra.mxu1 %vm1006_vm4, %v2443_v25 }
 0x1ab   :  { %1647 = vst [vmem:[#allocation6 + $0x18] sm:$0xff] %v1825_v31  ;;  %1648 = vst [vmem:[#allocation6 + $0x20] sm:$0xff] %v1826_v32  ;;  %2276 = vmatprep.mubr.msk.f32.mxu1 %vm1007_vm5, %v2443_v25 }
 0x1ac   :  { %v884_v33 = vpop.xlane.xlu1 %883  ;;  %v886_v34 = vpop.xlane.xlu0 %885 }
 0x1ad   :  { %vm1008_vm6 = vcmp.eq.s32.totalorder %v2690_v21, %v884_v33  ;;  %vm1009_vm7 = vcmp.eq.s32.totalorder %v2690_v21, %v886_v34 }
 0x1ae   :  { %v1827_v35 = vsel %vm1008_vm6, 1.0, %v2442_v23  ;;  %v1828_v36 = vsel %vm1009_vm7, 1.0, %v2442_v23  ;;  %2277 = vmatmul.mubr.msk.f32.gmra.mxu1 %vm1008_vm6, %v2443_v25 }
 0x1af   :  { %1649 = vst [vmem:[#allocation6 + $0x28] sm:$0xff] %v1827_v35  ;;  %1650 = vst [vmem:[#allocation6 + $0x30] sm:$0xff] %v1828_v36  ;;  %2279 = vmatprep.mubr.msk.f32.mxu1 %vm1009_vm7, %v2443_v25 }
 0x1b0   :  { %v888_v37 = vpop.xlane.xlu1 %887  ;;  %v890_v38 = vpop.xlane.xlu0 %889 }
 0x1b1   :  { %vm1010_vm8 = vcmp.eq.s32.totalorder %v2690_v21, %v888_v37  ;;  %vm1011_vm9 = vcmp.eq.s32.totalorder %v2690_v21, %v890_v38 }
 0x1b2   :  { %v1829_v39 = vsel %vm1010_vm8, 1.0, %v2442_v23  ;;  %v1830_v40 = vsel %vm1011_vm9, 1.0, %v2442_v23  ;;  %2280 = vmatmul.mubr.msk.f32.gmra.mxu1 %vm1010_vm8, %v2443_v25 }
 0x1b3   :  { %1651 = vst [vmem:[#allocation6 + $0x38] sm:$0xff] %v1829_v39  ;;  %1652 = vst [vmem:[#allocation6 + $0x40] sm:$0xff] %v1830_v40  ;;  %2282 = vmatprep.mubr.msk.f32.mxu1 %vm1011_vm9, %v2443_v25 }
 0x1b4   :  { %v892_v41 = vpop.xlane.xlu1 %891  ;;  %v894_v42 = vpop.xlane.xlu0 %893 }
 0x1b5   :  { %vm1012_vm10 = vcmp.eq.s32.totalorder %v2690_v21, %v892_v41  ;;  %vm1013_vm11 = vcmp.eq.s32.totalorder %v2690_v21, %v894_v42 }
 0x1b6   :  { %v1831_v43 = vsel %vm1012_vm10, 1.0, %v2442_v23  ;;  %v1832_v44 = vsel %vm1013_vm11, 1.0, %v2442_v23  ;;  %2283 = vmatmul.mubr.msk.f32.gmra.mxu1 %vm1012_vm10, %v2443_v25 }
 0x1b7   :  { %1653 = vst [vmem:[#allocation6 + $0x48] sm:$0xff] %v1831_v43  ;;  %1654 = vst [vmem:[#allocation6 + $0x50] sm:$0xff] %v1832_v44  ;;  %2285 = vmatprep.mubr.msk.f32.mxu1 %vm1013_vm11, %v2443_v25 }
 0x1b8   :  { %v896_v45 = vpop.xlane.xlu1 %895  ;;  %v898_v46 = vpop.xlane.xlu0 %897 }
 0x1b9   :  { %vm1014_vm12 = vcmp.eq.s32.totalorder %v2690_v21, %v896_v45  ;;  %vm1015_vm13 = vcmp.eq.s32.totalorder %v2690_v21, %v898_v46 }
 0x1ba   :  { %v1833_v47 = vsel %vm1014_vm12, 1.0, %v2442_v23  ;;  %v1834_v48 = vsel %vm1015_vm13, 1.0, %v2442_v23  ;;  %2286 = vmatmul.mubr.msk.f32.gmra.mxu1 %vm1014_vm12, %v2443_v25 }
 0x1bb   :  { %1655 = vst [vmem:[#allocation6 + $0x58] sm:$0xff] %v1833_v47  ;;  %1656 = vst [vmem:[#allocation6 + $0x60] sm:$0xff] %v1834_v48  ;;  %2288 = vmatprep.mubr.msk.f32.mxu1 %vm1015_vm13, %v2443_v25 }
 0x1bc   :  { %v900_v49 = vpop.xlane.xlu1 %899  ;;  %v902_v50 = vpop.xlane.xlu0 %901 }
 0x1bd   :  { %vm1016_vm14 = vcmp.eq.s32.totalorder %v2690_v21, %v900_v49  ;;  %vm1017_vm15 = vcmp.eq.s32.totalorder %v2690_v21, %v902_v50 }
 0x1be   :  { %v1835_v51 = vsel %vm1016_vm14, 1.0, %v2442_v23  ;;  %v1836_v52 = vsel %vm1017_vm15, 1.0, %v2442_v23  ;;  %2289 = vmatmul.mubr.msk.f32.gmra.mxu1 %vm1016_vm14, %v2443_v25 }
 0x1bf   :  { %1657 = vst [vmem:[#allocation6 + $0x68] sm:$0xff] %v1835_v51  ;;  %1658 = vst [vmem:[#allocation6 + $0x70] sm:$0xff] %v1836_v52  ;;  %2291 = vmatprep.mubr.msk.f32.mxu1 %vm1017_vm15, %v2443_v25 }
 0x1c0   :  { %v904_v53 = vpop.xlane.xlu1 %903  ;;  %v906_v54 = vpop.xlane.xlu0 %905 }
 0x1c1   :  { %vm1018_vm1 = vcmp.eq.s32.totalorder %v2690_v21, %v904_v53  ;;  %vm1019_vm2 = vcmp.eq.s32.totalorder %v2690_v21, %v906_v54 }
 0x1c2   :  { %v1837_v55 = vsel %vm1018_vm1, 1.0, %v2442_v23  ;;  %v1838_v56 = vsel %vm1019_vm2, 1.0, %v2442_v23  ;;  %2292 = vmatmul.mubr.msk.f32.gmra.mxu1 %vm1018_vm1, %v2443_v25 }
 0x1c3   :  { %1659 = vst [vmem:[#allocation6 + $0x78] sm:$0xff] %v1837_v55  ;;  %1660 = vst [vmem:[#allocation6 + $0x80] sm:$0xff] %v1838_v56  ;;  %2294 = vmatprep.mubr.msk.f32.mxu1 %vm1019_vm2, %v2443_v25 }
 0x1c4   :  { %v908_v57 = vpop.xlane.xlu1 %907  ;;  %v910_v58 = vpop.xlane.xlu0 %909 }
 0x1c5   :  { %vm1020_vm3 = vcmp.eq.s32.totalorder %v2690_v21, %v908_v57  ;;  %vm1021_vm4 = vcmp.eq.s32.totalorder %v2690_v21, %v910_v58 }
 0x1c6   :  { %v1839_v59 = vsel %vm1020_vm3, 1.0, %v2442_v23  ;;  %v1840_v60 = vsel %vm1021_vm4, 1.0, %v2442_v23  ;;  %2295 = vmatmul.mubr.msk.f32.gmra.mxu1 %vm1020_vm3, %v2443_v25 }
 0x1c7   :  { %1661 = vst [vmem:[#allocation6 + $0x88] sm:$0xff] %v1839_v59  ;;  %1662 = vst [vmem:[#allocation6 + $0x90] sm:$0xff] %v1840_v60  ;;  %2297 = vmatprep.mubr.msk.f32.mxu1 %vm1021_vm4, %v2443_v25 }
 0x1c8   :  { %v912_v61 = vpop.xlane.xlu1 %911  ;;  %v914_v62 = vpop.xlane.xlu0 %913 }
 0x1c9   :  { %vm1022_vm5 = vcmp.eq.s32.totalorder %v2690_v21, %v912_v61  ;;  %vm1023_vm6 = vcmp.eq.s32.totalorder %v2690_v21, %v914_v62 }
 0x1ca   :  { %v1841_v63 = vsel %vm1022_vm5, 1.0, %v2442_v23  ;;  %v1842_v0 = vsel %vm1023_vm6, 1.0, %v2442_v23  ;;  %2298 = vmatmul.mubr.msk.f32.gmra.mxu1 %vm1022_vm5, %v2443_v25 }
 0x1cb   :  { %1663 = vst [vmem:[#allocation6 + $0x98] sm:$0xff] %v1841_v63  ;;  %1664 = vst [vmem:[#allocation6 + $0xa0] sm:$0xff] %v1842_v0  ;;  %2300 = vmatprep.mubr.msk.f32.mxu1 %vm1023_vm6, %v2443_v25 }
 0x1cc   :  { %v916_v1 = vpop.xlane.xlu1 %915  ;;  %v918_v2 = vpop.xlane.xlu0 %917 }
 0x1cd   :  { %vm1024_vm7 = vcmp.eq.s32.totalorder %v2690_v21, %v916_v1  ;;  %vm1025_vm8 = vcmp.eq.s32.totalorder %v2690_v21, %v918_v2 }
 0x1ce   :  { %v1843_v3 = vsel %vm1024_vm7, 1.0, %v2442_v23  ;;  %v1844_v4 = vsel %vm1025_vm8, 1.0, %v2442_v23  ;;  %2301 = vmatmul.mubr.msk.f32.gmra.mxu1 %vm1024_vm7, %v2443_v25 }
 0x1cf   :  { %1665 = vst [vmem:[#allocation6 + $0xa8] sm:$0xff] %v1843_v3  ;;  %1666 = vst [vmem:[#allocation6 + $0xb0] sm:$0xff] %v1844_v4  ;;  %2303 = vmatprep.mubr.msk.f32.mxu1 %vm1025_vm8, %v2443_v25 }
 0x1d0   :  { %v920_v5 = vpop.xlane.xlu1 %919  ;;  %v922_v6 = vpop.xlane.xlu0 %921 }
 0x1d1   :  { %vm1026_vm9 = vcmp.eq.s32.totalorder %v2690_v21, %v920_v5  ;;  %vm1027_vm10 = vcmp.eq.s32.totalorder %v2690_v21, %v922_v6 }
 0x1d2   :  { %v1845_v7 = vsel %vm1026_vm9, 1.0, %v2442_v23  ;;  %v1846_v8 = vsel %vm1027_vm10, 1.0, %v2442_v23  ;;  %2304 = vmatmul.mubr.msk.f32.gmra.mxu1 %vm1026_vm9, %v2443_v25 }
 0x1d3   :  { %1667 = vst [vmem:[#allocation6 + $0xb8] sm:$0xff] %v1845_v7  ;;  %1668 = vst [vmem:[#allocation6 + $0xc0] sm:$0xff] %v1846_v8  ;;  %2306 = vmatprep.mubr.msk.f32.mxu1 %vm1027_vm10, %v2443_v25 }
 0x1d4   :  { %v924_v9 = vpop.xlane.xlu1 %923  ;;  %v926_v10 = vpop.xlane.xlu0 %925 }
 0x1d5   :  { %vm1028_vm11 = vcmp.eq.s32.totalorder %v2690_v21, %v924_v9  ;;  %vm1029_vm12 = vcmp.eq.s32.totalorder %v2690_v21, %v926_v10 }
 0x1d6   :  { %v1847_v11 = vsel %vm1028_vm11, 1.0, %v2442_v23  ;;  %v1848_v12 = vsel %vm1029_vm12, 1.0, %v2442_v23  ;;  %2307 = vmatmul.mubr.msk.f32.gmra.mxu1 %vm1028_vm11, %v2443_v25 }
 0x1d7   :  { %1669 = vst [vmem:[#allocation6 + $0xc8] sm:$0xff] %v1847_v11  ;;  %1670 = vst [vmem:[#allocation6 + $0xd0] sm:$0xff] %v1848_v12  ;;  %2309 = vmatprep.mubr.msk.f32.mxu1 %vm1029_vm12, %v2443_v25 }
 0x1d8   :  { %v928_v13 = vpop.xlane.xlu1 %927  ;;  %v930_v14 = vpop.xlane.xlu0 %929 }
 0x1d9   :  { %vm1030_vm13 = vcmp.eq.s32.totalorder %v2690_v21, %v928_v13  ;;  %vm1031_vm14 = vcmp.eq.s32.totalorder %v2690_v21, %v930_v14 }
 0x1da   :  { %v1849_v15 = vsel %vm1030_vm13, 1.0, %v2442_v23  ;;  %v1850_v16 = vsel %vm1031_vm14, 1.0, %v2442_v23  ;;  %2310 = vmatmul.mubr.msk.f32.gmra.mxu1 %vm1030_vm13, %v2443_v25 }
 0x1db   :  { %1671 = vst [vmem:[#allocation6 + $0xd8] sm:$0xff] %v1849_v15  ;;  %1672 = vst [vmem:[#allocation6 + $0xe0] sm:$0xff] %v1850_v16  ;;  %2312 = vmatprep.mubr.msk.f32.mxu1 %vm1031_vm14, %v2443_v25 }
 0x1dc   :  { %v932_v17 = vpop.xlane.xlu1 %931  ;;  %v934_v18 = vpop.xlane.xlu0 %933 }
 0x1dd   :  { %vm1032_vm15 = vcmp.eq.s32.totalorder %v2690_v21, %v932_v17  ;;  %vm1033_vm1 = vcmp.eq.s32.totalorder %v2690_v21, %v934_v18 }
 0x1de   :  { %v1851_v19 = vsel %vm1032_vm15, 1.0, %v2442_v23  ;;  %v1852_v22 = vsel %vm1033_vm1, 1.0, %v2442_v23  ;;  %2313 = vmatmul.mubr.msk.f32.gmra.mxu1 %vm1032_vm15, %v2443_v25 }
 0x1df   :  { %1673 = vst [vmem:[#allocation6 + $0xe8] sm:$0xff] %v1851_v19  ;;  %1674 = vst [vmem:[#allocation6 + $0xf0] sm:$0xff] %v1852_v22  ;;  %2315 = vmatprep.mubr.msk.f32.mxu1 %vm1033_vm1, %v2443_v25 }
 0x1e0   :  { %v936_v24 = vpop.xlane.xlu1 %935  ;;  %v938_v26 = vpop.xlane.xlu0 %937 }
 0x1e1   :  { %vm1034_vm2 = vcmp.eq.s32.totalorder %v2690_v21, %v936_v24  ;;  %vm1035_vm3 = vcmp.eq.s32.totalorder %v2690_v21, %v938_v26 }
 0x1e2   :  { %v1853_v27 = vsel %vm1034_vm2, 1.0, %v2442_v23  ;;  %v1854_v20 = vsel %vm1035_vm3, 1.0, %v2442_v23  ;;  %2316 = vmatmul.mubr.msk.f32.gmra.mxu1 %vm1034_vm2, %v2443_v25 }
 0x1e3   :  { %1675 = vst [vmem:[#allocation6 + $0xf8] sm:$0xff] %v1853_v27  ;;  %1676 = vst [vmem:[#allocation6 + $0x100] sm:$0xff] %v1854_v20  ;;  %2318 = vmatprep.mubr.msk.f32.mxu1 %vm1035_vm3, %v2443_v25 }
 0x1e4   :  { %v940_v28 = vpop.xlane.xlu1 %939  ;;  %v942_v29 = vpop.xlane.xlu0 %941 }
 0x1e5   :  { %vm1036_vm4 = vcmp.eq.s32.totalorder %v2690_v21, %v940_v28  ;;  %vm1037_vm5 = vcmp.eq.s32.totalorder %v2690_v21, %v942_v29 }
 0x1e6   :  { %v1855_v30 = vsel %vm1036_vm4, 1.0, %v2442_v23  ;;  %v1856_v31 = vsel %vm1037_vm5, 1.0, %v2442_v23  ;;  %2319 = vmatmul.mubr.msk.f32.gmra.mxu1 %vm1036_vm4, %v2443_v25 }
 0x1e7   :  { %1677 = vst [vmem:[#allocation6 + $0x108] sm:$0xff] %v1855_v30  ;;  %1678 = vst [vmem:[#allocation6 + $0x110] sm:$0xff] %v1856_v31  ;;  %2321 = vmatprep.mubr.msk.f32.mxu1 %vm1037_vm5, %v2443_v25 }
 0x1e8   :  { %v944_v32 = vpop.xlane.xlu1 %943  ;;  %v946_v33 = vpop.xlane.xlu0 %945 }
 0x1e9   :  { %vm1038_vm6 = vcmp.eq.s32.totalorder %v2690_v21, %v944_v32  ;;  %vm1039_vm7 = vcmp.eq.s32.totalorder %v2690_v21, %v946_v33 }
 0x1ea   :  { %v1857_v34 = vsel %vm1038_vm6, 1.0, %v2442_v23  ;;  %v1858_v35 = vsel %vm1039_vm7, 1.0, %v2442_v23  ;;  %2322 = vmatmul.mubr.msk.f32.gmra.mxu1 %vm1038_vm6, %v2443_v25 }
 0x1eb   :  { %1679 = vst [vmem:[#allocation6 + $0x118] sm:$0xff] %v1857_v34  ;;  %1680 = vst [vmem:[#allocation6 + $0x120] sm:$0xff] %v1858_v35  ;;  %2324 = vmatprep.mubr.msk.f32.mxu1 %vm1039_vm7, %v2443_v25 }
 0x1ec   :  { %v948_v36 = vpop.xlane.xlu1 %947  ;;  %v950_v37 = vpop.xlane.xlu0 %949 }
 0x1ed   :  { %vm1040_vm8 = vcmp.eq.s32.totalorder %v2690_v21, %v948_v36  ;;  %vm1041_vm9 = vcmp.eq.s32.totalorder %v2690_v21, %v950_v37 }
 0x1ee   :  { %v1859_v38 = vsel %vm1040_vm8, 1.0, %v2442_v23  ;;  %v1860_v39 = vsel %vm1041_vm9, 1.0, %v2442_v23  ;;  %2325 = vmatmul.mubr.msk.f32.gmra.mxu1 %vm1040_vm8, %v2443_v25 }
 0x1ef   :  { %1681 = vst [vmem:[#allocation6 + $0x128] sm:$0xff] %v1859_v38  ;;  %1682 = vst [vmem:[#allocation6 + $0x130] sm:$0xff] %v1860_v39  ;;  %2327 = vmatprep.mubr.msk.f32.mxu1 %vm1041_vm9, %v2443_v25 }
 0x1f0   :  { %v952_v40 = vpop.xlane.xlu1 %951  ;;  %v954_v41 = vpop.xlane.xlu0 %953 }
 0x1f1   :  { %vm1042_vm10 = vcmp.eq.s32.totalorder %v2690_v21, %v952_v40  ;;  %vm1043_vm11 = vcmp.eq.s32.totalorder %v2690_v21, %v954_v41 }
 0x1f2   :  { %v1861_v42 = vsel %vm1042_vm10, 1.0, %v2442_v23  ;;  %v1862_v43 = vsel %vm1043_vm11, 1.0, %v2442_v23  ;;  %2328 = vmatmul.mubr.msk.f32.gmra.mxu1 %vm1042_vm10, %v2443_v25 }
 0x1f3   :  { %1683 = vst [vmem:[#allocation6 + $0x138] sm:$0xff] %v1861_v42  ;;  %1684 = vst [vmem:[#allocation6 + $0x140] sm:$0xff] %v1862_v43  ;;  %2330 = vmatprep.mubr.msk.f32.mxu1 %vm1043_vm11, %v2443_v25 }
 0x1f4   :  { %v956_v44 = vpop.xlane.xlu1 %955  ;;  %v958_v45 = vpop.xlane.xlu0 %957 }
 0x1f5   :  { %vm1044_vm12 = vcmp.eq.s32.totalorder %v2690_v21, %v956_v44  ;;  %vm1045_vm13 = vcmp.eq.s32.totalorder %v2690_v21, %v958_v45 }
 0x1f6   :  { %v1863_v46 = vsel %vm1044_vm12, 1.0, %v2442_v23  ;;  %v1864_v47 = vsel %vm1045_vm13, 1.0, %v2442_v23  ;;  %2331 = vmatmul.mubr.msk.f32.gmra.mxu1 %vm1044_vm12, %v2443_v25 }
 0x1f7   :  { %1685 = vst [vmem:[#allocation6 + $0x148] sm:$0xff] %v1863_v46  ;;  %1686 = vst [vmem:[#allocation6 + $0x150] sm:$0xff] %v1864_v47  ;;  %2333 = vmatprep.mubr.msk.f32.mxu1 %vm1045_vm13, %v2443_v25 }
 0x1f8   :  { %v960_v48 = vpop.xlane.xlu1 %959  ;;  %v962_v49 = vpop.xlane.xlu0 %961 }
 0x1f9   :  { %vm1046_vm14 = vcmp.eq.s32.totalorder %v2690_v21, %v960_v48  ;;  %vm1047_vm15 = vcmp.eq.s32.totalorder %v2690_v21, %v962_v49 }
 0x1fa   :  { %v1865_v50 = vsel %vm1046_vm14, 1.0, %v2442_v23  ;;  %v1866_v51 = vsel %vm1047_vm15, 1.0, %v2442_v23  ;;  %2334 = vmatmul.mubr.msk.f32.gmra.mxu1 %vm1046_vm14, %v2443_v25 }
 0x1fb   :  { %1687 = vst [vmem:[#allocation6 + $0x158] sm:$0xff] %v1865_v50  ;;  %1688 = vst [vmem:[#allocation6 + $0x160] sm:$0xff] %v1866_v51  ;;  %2336 = vmatprep.mubr.msk.f32.mxu1 %vm1047_vm15, %v2443_v25 }
 0x1fc   :  { %v964_v52 = vpop.xlane.xlu1 %963  ;;  %v966_v53 = vpop.xlane.xlu0 %965 }
 0x1fd   :  { %vm1048_vm1 = vcmp.eq.s32.totalorder %v2690_v21, %v964_v52  ;;  %vm1049_vm2 = vcmp.eq.s32.totalorder %v2690_v21, %v966_v53 }
 0x1fe   :  { %v1867_v54 = vsel %vm1048_vm1, 1.0, %v2442_v23  ;;  %v1868_v55 = vsel %vm1049_vm2, 1.0, %v2442_v23  ;;  %2337 = vmatmul.mubr.msk.f32.gmra.mxu1 %vm1048_vm1, %v2443_v25 }
 0x1ff   :  { %1689 = vst [vmem:[#allocation6 + $0x168] sm:$0xff] %v1867_v54  ;;  %1690 = vst [vmem:[#allocation6 + $0x170] sm:$0xff] %v1868_v55  ;;  %2339 = vmatprep.mubr.msk.f32.mxu1 %vm1049_vm2, %v2443_v25 }
 0x200   :  { %v968_v56 = vpop.xlane.xlu1 %967  ;;  %v970_v57 = vpop.xlane.xlu0 %969 }
 0x201   :  { %vm1050_vm3 = vcmp.eq.s32.totalorder %v2690_v21, %v968_v56  ;;  %vm1051_vm4 = vcmp.eq.s32.totalorder %v2690_v21, %v970_v57 }
 0x202   :  { %v1869_v58 = vsel %vm1050_vm3, 1.0, %v2442_v23  ;;  %v1870_v59 = vsel %vm1051_vm4, 1.0, %v2442_v23  ;;  %2340 = vmatmul.mubr.msk.f32.gmra.mxu1 %vm1050_vm3, %v2443_v25 }
 0x203   :  { %1691 = vst [vmem:[#allocation6 + $0x178] sm:$0xff] %v1869_v58  ;;  %1692 = vst [vmem:[#allocation6 + $0x180] sm:$0xff] %v1870_v59  ;;  %2342 = vmatprep.mubr.msk.f32.mxu1 %vm1051_vm4, %v2443_v25 }
 0x204   :  { %v972_v60 = vpop.xlane.xlu1 %971  ;;  %v974_v61 = vpop.xlane.xlu0 %973 }
 0x205   :  { %vm1052_vm5 = vcmp.eq.s32.totalorder %v2690_v21, %v972_v60  ;;  %vm1053_vm6 = vcmp.eq.s32.totalorder %v2690_v21, %v974_v61 }
 0x206   :  { %v1871_v62 = vsel %vm1052_vm5, 1.0, %v2442_v23  ;;  %v1872_v63 = vsel %vm1053_vm6, 1.0, %v2442_v23  ;;  %2343 = vmatmul.mubr.msk.f32.gmra.mxu1 %vm1052_vm5, %v2443_v25 }
 0x207   :  { %1693 = vst [vmem:[#allocation6 + $0x188] sm:$0xff] %v1871_v62  ;;  %1694 = vst [vmem:[#allocation6 + $0x190] sm:$0xff] %v1872_v63  ;;  %2345 = vmatprep.mubr.msk.f32.mxu1 %vm1053_vm6, %v2443_v25 }
 0x208   :  { %v976_v0 = vpop.xlane.xlu1 %975  ;;  %v978_v1 = vpop.xlane.xlu0 %977 }
 0x209   :  { %vm1054_vm7 = vcmp.eq.s32.totalorder %v2690_v21, %v976_v0  ;;  %vm1055_vm8 = vcmp.eq.s32.totalorder %v2690_v21, %v978_v1 }
 0x20a   :  { %v1873_v2 = vsel %vm1054_vm7, 1.0, %v2442_v23  ;;  %v1874_v3 = vsel %vm1055_vm8, 1.0, %v2442_v23  ;;  %2346 = vmatmul.mubr.msk.f32.gmra.mxu1 %vm1054_vm7, %v2443_v25 }
 0x20b   :  { %1695 = vst [vmem:[#allocation6 + $0x198] sm:$0xff] %v1873_v2  ;;  %1696 = vst [vmem:[#allocation6 + $0x1a0] sm:$0xff] %v1874_v3  ;;  %2348 = vmatprep.mubr.msk.f32.mxu1 %vm1055_vm8, %v2443_v25 }
 0x20c   :  { %v980_v4 = vpop.xlane.xlu1 %979  ;;  %v982_v5 = vpop.xlane.xlu0 %981 }
 0x20d   :  { %vm1056_vm9 = vcmp.eq.s32.totalorder %v2690_v21, %v980_v4  ;;  %vm1057_vm10 = vcmp.eq.s32.totalorder %v2690_v21, %v982_v5 }
 0x20e   :  { %v1875_v6 = vsel %vm1056_vm9, 1.0, %v2442_v23  ;;  %v1876_v7 = vsel %vm1057_vm10, 1.0, %v2442_v23  ;;  %2349 = vmatmul.mubr.msk.f32.gmra.mxu1 %vm1056_vm9, %v2443_v25 }
 0x20f   :  { %1697 = vst [vmem:[#allocation6 + $0x1a8] sm:$0xff] %v1875_v6  ;;  %1698 = vst [vmem:[#allocation6 + $0x1b0] sm:$0xff] %v1876_v7  ;;  %2351 = vmatprep.mubr.msk.f32.mxu1 %vm1057_vm10, %v2443_v25 }
 0x210   :  { %v984_v8 = vpop.xlane.xlu1 %983  ;;  %v986_v9 = vpop.xlane.xlu0 %985 }
 0x211   :  { %vm1058_vm11 = vcmp.eq.s32.totalorder %v2690_v21, %v984_v8  ;;  %vm1059_vm12 = vcmp.eq.s32.totalorder %v2690_v21, %v986_v9 }
 0x212   :  { %v1877_v10 = vsel %vm1058_vm11, 1.0, %v2442_v23  ;;  %v1878_v11 = vsel %vm1059_vm12, 1.0, %v2442_v23  ;;  %2352 = vmatmul.mubr.msk.f32.gmra.mxu1 %vm1058_vm11, %v2443_v25 }
 0x213   :  { %1699 = vst [vmem:[#allocation6 + $0x1b8] sm:$0xff] %v1877_v10  ;;  %1700 = vst [vmem:[#allocation6 + $0x1c0] sm:$0xff] %v1878_v11  ;;  %2354 = vmatprep.mubr.msk.f32.mxu1 %vm1059_vm12, %v2443_v25 }
 0x214   :  { %v988_v12 = vpop.xlane.xlu1 %987  ;;  %v990_v13 = vpop.xlane.xlu0 %989 }
 0x215   :  { %vm1060_vm13 = vcmp.eq.s32.totalorder %v2690_v21, %v988_v12  ;;  %vm1061_vm14 = vcmp.eq.s32.totalorder %v2690_v21, %v990_v13 }
 0x216   :  { %v1879_v14 = vsel %vm1060_vm13, 1.0, %v2442_v23  ;;  %v1880_v15 = vsel %vm1061_vm14, 1.0, %v2442_v23  ;;  %2355 = vmatmul.mubr.msk.f32.gmra.mxu1 %vm1060_vm13, %v2443_v25 }
 0x217   :  { %1701 = vst [vmem:[#allocation6 + $0x1c8] sm:$0xff] %v1879_v14  ;;  %1702 = vst [vmem:[#allocation6 + $0x1d0] sm:$0xff] %v1880_v15  ;;  %2357 = vmatprep.mubr.msk.f32.mxu1 %vm1061_vm14, %v2443_v25 }
 0x218   :  { %v992_v16 = vpop.xlane.xlu1 %991  ;;  %v994_v17 = vpop.xlane.xlu0 %993 }
 0x219   :  { %vm1062_vm15 = vcmp.eq.s32.totalorder %v2690_v21, %v992_v16  ;;  %vm1063_vm1 = vcmp.eq.s32.totalorder %v2690_v21, %v994_v17 }
 0x21a   :  { %v1881_v18 = vsel %vm1062_vm15, 1.0, %v2442_v23  ;;  %v1882_v19 = vsel %vm1063_vm1, 1.0, %v2442_v23  ;;  %2358 = vmatmul.mubr.msk.f32.gmra.mxu1 %vm1062_vm15, %v2443_v25 }
 0x21b   :  { %1703 = vst [vmem:[#allocation6 + $0x1d8] sm:$0xff] %v1881_v18  ;;  %1704 = vst [vmem:[#allocation6 + $0x1e0] sm:$0xff] %v1882_v19  ;;  %2360 = vmatprep.mubr.msk.f32.mxu1 %vm1063_vm1, %v2443_v25 }
 0x21c   :  { %v996_v22 = vpop.xlane.xlu1 %995  ;;  %v998_v24 = vpop.xlane.xlu0 %997 }
 0x21d   :  { %vm1064_vm2 = vcmp.eq.s32.totalorder %v2690_v21, %v996_v22  ;;  %vm1065_vm3 = vcmp.eq.s32.totalorder %v2690_v21, %v998_v24 }
 0x21e   :  { %v1883_v26 = vsel %vm1064_vm2, 1.0, %v2442_v23  ;;  %v1884_v27 = vsel %vm1065_vm3, 1.0, %v2442_v23  ;;  %2361 = vmatmul.mubr.msk.f32.gmra.mxu1 %vm1064_vm2, %v2443_v25 }
 0x21f   :  { %1705 = vst [vmem:[#allocation6 + $0x1e8] sm:$0xff] %v1883_v26  ;;  %1706 = vst [vmem:[#allocation6 + $0x1f0] sm:$0xff] %v1884_v27  ;;  %2363 = vmatprep.mubr.msk.f32.mxu1 %vm1065_vm3, %v2443_v25 }
 0x220   :  { %v1000_v20 = vpop.xlane.xlu1 %999 }
 0x221   :  { %vm1066_vm4 = vcmp.eq.s32.totalorder %v2690_v21, %v1000_v20 }
 0x222   :  { %v1885_v28 = vsel %vm1066_vm4, 1.0, %v2442_v23  ;;  %2364 = vmatmul.mubr.msk.f32.gmra.mxu1 %vm1066_vm4, %v2443_v25 }
 0x223   :  { %1707 = vst [vmem:[#allocation6 + $0x1f8] sm:$0xff] %v1885_v28 }
 0x266   :  { %v2272_v29 = vpop.f32.mrf.mxu1 }
 0x267   :  { %2404 = shalt.err (!%p2401_p9)
}
 0x268   :  { %1731 = dma.vmem_to_hbm [thread:$0]  %s1726_s29, 8192, %s2964_s4, [#allocation7], %s2440_s18, %s2440_s18, %s2441_s19   ;;  %1581 = vst.msk [vmem:[#allocation5 + $0x8] sm:$0xff] %vm112_vm0, %v2272_v29  ;;  %v1261_v21 = vpop.f32.mrf.mxu1 }
 0x269   :  { %1580 = vst.msk [vmem:[#allocation5] sm:$0xff] %vm112_vm0, %v1261_v21  ;;  %s2445_s4 = smov [#allocation5]  }
 0x26a   :  { %v2275_v23 = vpop.f32.mrf.mxu1  ;;  %s1713_s7 = sshll.u32 %s2445_s4, 4  ;;  %s1714_s7 = int_to_ptr.vmem [resolvable:$true] %s1713_s7 }
 0x26b   :  { %1583 = vst.msk [vmem:[#allocation5 + $0x18] sm:$0xff] %vm112_vm0, %v2275_v23  ;;  %s2413_s8 = scalar_lea.vmem %s1714_s7, 8192  ;;  %p2418_p11 = scmp.lt.s32.totalorder %s1714_s7, %s1714_s7 }
 0x26c   :  { %v1271_v25 = vpop.f32.mrf.mxu1  ;;  %p2414_p10 = scmp.ne.s32.totalorder %s1714_s7, %s2413_s8  ;;  %p2419_p12 = scmp.lt.s32.totalorder %s2413_s8, %s2413_s8 }
 0x26d   :  { %1582 = vst.msk [vmem:[#allocation5 + $0x10] sm:$0xff] %vm112_vm0, %v1271_v25 }
 0x26e   :  { %v2278_v30 = vpop.f32.mrf.mxu1  ;;  %p2420_p13 = por %p2419_p12, %p2418_p11 }
 0x26f   :  { %1585 = vst.msk [vmem:[#allocation5 + $0x28] sm:$0xff] %vm112_vm0, %v2278_v30 }
 0x270   :  { %v1281_v31 = vpop.f32.mrf.mxu1  ;;  %p2421_p0 = pnand %p2420_p13, %p2414_p10 }
 0x271   :  { %1584 = vst.msk [vmem:[#allocation5 + $0x20] sm:$0xff] %vm112_vm0, %v1281_v31 }
 0x272   :  { %v2281_v32 = vpop.f32.mrf.mxu1 }
 0x273   :  { %1587 = vst.msk [vmem:[#allocation5 + $0x38] sm:$0xff] %vm112_vm0, %v2281_v32 }
 0x274   :  { %v1291_v33 = vpop.f32.mrf.mxu1 }
 0x275   :  { %1586 = vst.msk [vmem:[#allocation5 + $0x30] sm:$0xff] %vm112_vm0, %v1291_v33 }
 0x276   :  { %v2284_v34 = vpop.f32.mrf.mxu1 }
 0x277   :  { %1589 = vst.msk [vmem:[#allocation5 + $0x48] sm:$0xff] %vm112_vm0, %v2284_v34 }
 0x278   :  { %v1301_v35 = vpop.f32.mrf.mxu1 }
 0x279   :  { %1588 = vst.msk [vmem:[#allocation5 + $0x40] sm:$0xff] %vm112_vm0, %v1301_v35 }
 0x27a   :  { %v2287_v36 = vpop.f32.mrf.mxu1 }
 0x27b   :  { %1591 = vst.msk [vmem:[#allocation5 + $0x58] sm:$0xff] %vm112_vm0, %v2287_v36 }
 0x27c   :  { %v1311_v37 = vpop.f32.mrf.mxu1 }
 0x27d   :  { %1590 = vst.msk [vmem:[#allocation5 + $0x50] sm:$0xff] %vm112_vm0, %v1311_v37 }
 0x27e   :  { %v2290_v38 = vpop.f32.mrf.mxu1 }
 0x27f   :  { %1593 = vst.msk [vmem:[#allocation5 + $0x68] sm:$0xff] %vm112_vm0, %v2290_v38 }
 0x280   :  { %v1321_v39 = vpop.f32.mrf.mxu1 }
 0x281   :  { %1592 = vst.msk [vmem:[#allocation5 + $0x60] sm:$0xff] %vm112_vm0, %v1321_v39 }
 0x282   :  { %v2293_v40 = vpop.f32.mrf.mxu1 }
 0x283   :  { %1595 = vst.msk [vmem:[#allocation5 + $0x78] sm:$0xff] %vm112_vm0, %v2293_v40 }
 0x284   :  { %v1331_v41 = vpop.f32.mrf.mxu1 }
 0x285   :  { %1594 = vst.msk [vmem:[#allocation5 + $0x70] sm:$0xff] %vm112_vm0, %v1331_v41 }
 0x286   :  { %v2296_v42 = vpop.f32.mrf.mxu1 }
 0x287   :  { %1597 = vst.msk [vmem:[#allocation5 + $0x88] sm:$0xff] %vm112_vm0, %v2296_v42 }
 0x288   :  { %v1341_v43 = vpop.f32.mrf.mxu1 }
 0x289   :  { %1596 = vst.msk [vmem:[#allocation5 + $0x80] sm:$0xff] %vm112_vm0, %v1341_v43 }
 0x28a   :  { %v2299_v44 = vpop.f32.mrf.mxu1 }
 0x28b   :  { %1599 = vst.msk [vmem:[#allocation5 + $0x98] sm:$0xff] %vm112_vm0, %v2299_v44 }
 0x28c   :  { %v1351_v45 = vpop.f32.mrf.mxu1 }
 0x28d   :  { %1598 = vst.msk [vmem:[#allocation5 + $0x90] sm:$0xff] %vm112_vm0, %v1351_v45 }
 0x28e   :  { %v2302_v46 = vpop.f32.mrf.mxu1 }
 0x28f   :  { %1601 = vst.msk [vmem:[#allocation5 + $0xa8] sm:$0xff] %vm112_vm0, %v2302_v46 }
 0x290   :  { %v1361_v47 = vpop.f32.mrf.mxu1 }
 0x291   :  { %1600 = vst.msk [vmem:[#allocation5 + $0xa0] sm:$0xff] %vm112_vm0, %v1361_v47 }
 0x292   :  { %v2305_v48 = vpop.f32.mrf.mxu1 }
 0x293   :  { %1603 = vst.msk [vmem:[#allocation5 + $0xb8] sm:$0xff] %vm112_vm0, %v2305_v48 }
 0x294   :  { %v1371_v49 = vpop.f32.mrf.mxu1 }
 0x295   :  { %1602 = vst.msk [vmem:[#allocation5 + $0xb0] sm:$0xff] %vm112_vm0, %v1371_v49 }
 0x296   :  { %v2308_v50 = vpop.f32.mrf.mxu1 }
 0x297   :  { %1605 = vst.msk [vmem:[#allocation5 + $0xc8] sm:$0xff] %vm112_vm0, %v2308_v50 }
 0x298   :  { %v1381_v51 = vpop.f32.mrf.mxu1 }
 0x299   :  { %1604 = vst.msk [vmem:[#allocation5 + $0xc0] sm:$0xff] %vm112_vm0, %v1381_v51 }
 0x29a   :  { %v2311_v52 = vpop.f32.mrf.mxu1 }
 0x29b   :  { %1607 = vst.msk [vmem:[#allocation5 + $0xd8] sm:$0xff] %vm112_vm0, %v2311_v52 }
 0x29c   :  { %v1391_v53 = vpop.f32.mrf.mxu1 }
 0x29d   :  { %1606 = vst.msk [vmem:[#allocation5 + $0xd0] sm:$0xff] %vm112_vm0, %v1391_v53 }
 0x29e   :  { %v2314_v54 = vpop.f32.mrf.mxu1 }
 0x29f   :  { %1609 = vst.msk [vmem:[#allocation5 + $0xe8] sm:$0xff] %vm112_vm0, %v2314_v54 }
 0x2a0   :  { %v1401_v55 = vpop.f32.mrf.mxu1 }
 0x2a1   :  { %1608 = vst.msk [vmem:[#allocation5 + $0xe0] sm:$0xff] %vm112_vm0, %v1401_v55 }
 0x2a2   :  { %v2317_v56 = vpop.f32.mrf.mxu1 }
 0x2a3   :  { %1611 = vst.msk [vmem:[#allocation5 + $0xf8] sm:$0xff] %vm112_vm0, %v2317_v56 }
 0x2a4   :  { %v1411_v57 = vpop.f32.mrf.mxu1 }
 0x2a5   :  { %1610 = vst.msk [vmem:[#allocation5 + $0xf0] sm:$0xff] %vm112_vm0, %v1411_v57 }
 0x2a6   :  { %v2320_v58 = vpop.f32.mrf.mxu1 }
 0x2a7   :  { %1613 = vst.msk [vmem:[#allocation5 + $0x108] sm:$0xff] %vm112_vm0, %v2320_v58 }
 0x2a8   :  { %v1421_v59 = vpop.f32.mrf.mxu1 }
 0x2a9   :  { %1612 = vst.msk [vmem:[#allocation5 + $0x100] sm:$0xff] %vm112_vm0, %v1421_v59 }
 0x2aa   :  { %v2323_v60 = vpop.f32.mrf.mxu1 }
 0x2ab   :  { %1615 = vst.msk [vmem:[#allocation5 + $0x118] sm:$0xff] %vm112_vm0, %v2323_v60 }
 0x2ac   :  { %v1431_v61 = vpop.f32.mrf.mxu1 }
 0x2ad   :  { %1614 = vst.msk [vmem:[#allocation5 + $0x110] sm:$0xff] %vm112_vm0, %v1431_v61 }
 0x2ae   :  { %v2326_v62 = vpop.f32.mrf.mxu1 }
 0x2af   :  { %1617 = vst.msk [vmem:[#allocation5 + $0x128] sm:$0xff] %vm112_vm0, %v2326_v62 }
 0x2b0   :  { %v1441_v63 = vpop.f32.mrf.mxu1 }
 0x2b1   :  { %1616 = vst.msk [vmem:[#allocation5 + $0x120] sm:$0xff] %vm112_vm0, %v1441_v63 }
 0x2b2   :  { %v2329_v0 = vpop.f32.mrf.mxu1 }
 0x2b3   :  { %1619 = vst.msk [vmem:[#allocation5 + $0x138] sm:$0xff] %vm112_vm0, %v2329_v0 }
 0x2b4   :  { %v1451_v1 = vpop.f32.mrf.mxu1 }
 0x2b5   :  { %1618 = vst.msk [vmem:[#allocation5 + $0x130] sm:$0xff] %vm112_vm0, %v1451_v1 }
 0x2b6   :  { %v2332_v2 = vpop.f32.mrf.mxu1 }
 0x2b7   :  { %1621 = vst.msk [vmem:[#allocation5 + $0x148] sm:$0xff] %vm112_vm0, %v2332_v2 }
 0x2b8   :  { %v1461_v3 = vpop.f32.mrf.mxu1 }
 0x2b9   :  { %1620 = vst.msk [vmem:[#allocation5 + $0x140] sm:$0xff] %vm112_vm0, %v1461_v3 }
 0x2ba   :  { %v2335_v4 = vpop.f32.mrf.mxu1 }
 0x2bb   :  { %1623 = vst.msk [vmem:[#allocation5 + $0x158] sm:$0xff] %vm112_vm0, %v2335_v4 }
 0x2bc   :  { %v1471_v5 = vpop.f32.mrf.mxu1 }
 0x2bd   :  { %1622 = vst.msk [vmem:[#allocation5 + $0x150] sm:$0xff] %vm112_vm0, %v1471_v5 }
 0x2be   :  { %v2338_v6 = vpop.f32.mrf.mxu1 }
 0x2bf   :  { %1625 = vst.msk [vmem:[#allocation5 + $0x168] sm:$0xff] %vm112_vm0, %v2338_v6 }
 0x2c0   :  { %v1481_v7 = vpop.f32.mrf.mxu1 }
 0x2c1   :  { %1624 = vst.msk [vmem:[#allocation5 + $0x160] sm:$0xff] %vm112_vm0, %v1481_v7 }
 0x2c2   :  { %v2341_v8 = vpop.f32.mrf.mxu1 }
 0x2c3   :  { %1627 = vst.msk [vmem:[#allocation5 + $0x178] sm:$0xff] %vm112_vm0, %v2341_v8 }
 0x2c4   :  { %v1491_v9 = vpop.f32.mrf.mxu1 }
 0x2c5   :  { %1626 = vst.msk [vmem:[#allocation5 + $0x170] sm:$0xff] %vm112_vm0, %v1491_v9 }
 0x2c6   :  { %v2344_v10 = vpop.f32.mrf.mxu1 }
 0x2c7   :  { %1629 = vst.msk [vmem:[#allocation5 + $0x188] sm:$0xff] %vm112_vm0, %v2344_v10 }
 0x2c8   :  { %v1501_v11 = vpop.f32.mrf.mxu1 }
 0x2c9   :  { %1628 = vst.msk [vmem:[#allocation5 + $0x180] sm:$0xff] %vm112_vm0, %v1501_v11 }
 0x2ca   :  { %v2347_v12 = vpop.f32.mrf.mxu1 }
 0x2cb   :  { %1631 = vst.msk [vmem:[#allocation5 + $0x198] sm:$0xff] %vm112_vm0, %v2347_v12 }
 0x2cc   :  { %v1511_v13 = vpop.f32.mrf.mxu1 }
 0x2cd   :  { %1630 = vst.msk [vmem:[#allocation5 + $0x190] sm:$0xff] %vm112_vm0, %v1511_v13 }
 0x2ce   :  { %v2350_v14 = vpop.f32.mrf.mxu1 }
 0x2cf   :  { %1633 = vst.msk [vmem:[#allocation5 + $0x1a8] sm:$0xff] %vm112_vm0, %v2350_v14 }
 0x2d0   :  { %v1521_v15 = vpop.f32.mrf.mxu1 }
 0x2d1   :  { %1632 = vst.msk [vmem:[#allocation5 + $0x1a0] sm:$0xff] %vm112_vm0, %v1521_v15 }
 0x2d2   :  { %v2353_v16 = vpop.f32.mrf.mxu1 }
 0x2d3   :  { %1635 = vst.msk [vmem:[#allocation5 + $0x1b8] sm:$0xff] %vm112_vm0, %v2353_v16 }
 0x2d4   :  { %v1531_v17 = vpop.f32.mrf.mxu1 }
 0x2d5   :  { %1634 = vst.msk [vmem:[#allocation5 + $0x1b0] sm:$0xff] %vm112_vm0, %v1531_v17 }
 0x2d6   :  { %v2356_v18 = vpop.f32.mrf.mxu1 }
 0x2d7   :  { %1637 = vst.msk [vmem:[#allocation5 + $0x1c8] sm:$0xff] %vm112_vm0, %v2356_v18 }
 0x2d8   :  { %v1541_v19 = vpop.f32.mrf.mxu1 }
 0x2d9   :  { %1636 = vst.msk [vmem:[#allocation5 + $0x1c0] sm:$0xff] %vm112_vm0, %v1541_v19 }
 0x2da   :  { %v2359_v22 = vpop.f32.mrf.mxu1 }
 0x2db   :  { %1639 = vst.msk [vmem:[#allocation5 + $0x1d8] sm:$0xff] %vm112_vm0, %v2359_v22 }
 0x2dc   :  { %v1551_v24 = vpop.f32.mrf.mxu1 }
 0x2dd   :  { %1638 = vst.msk [vmem:[#allocation5 + $0x1d0] sm:$0xff] %vm112_vm0, %v1551_v24 }
 0x2de   :  { %v2362_v26 = vpop.f32.mrf.mxu1 }
 0x2df   :  { %1641 = vst.msk [vmem:[#allocation5 + $0x1e8] sm:$0xff] %vm112_vm0, %v2362_v26 }
 0x2e0   :  { %v1561_v27 = vpop.f32.mrf.mxu1 }
 0x2e1   :  { %1640 = vst.msk [vmem:[#allocation5 + $0x1e0] sm:$0xff] %vm112_vm0, %v1561_v27 }
 0x2e2   :  { %v2365_v20 = vpop.f32.mrf.mxu1 }
 0x2e3   :  { %1643 = vst.msk [vmem:[#allocation5 + $0x1f8] sm:$0xff] %vm112_vm0, %v2365_v20 }
 0x2e4   :  { %v1571_v28 = vpop.f32.mrf.mxu1 }
 0x2e5   :  { %1642 = vst.msk [vmem:[#allocation5 + $0x1f0] sm:$0xff] %vm112_vm0, %v1571_v28 }
 0x2e6   :  { %2424 = shalt.err (!%p2421_p0)
}
 0x2e7   :  { %1719 = dma.vmem_to_hbm [thread:$0]  %s1714_s7, 8192, %s2963_s3, [#allocation4], %s2440_s18, %s2440_s18, %s2441_s19  }
 0x2e8   :  { %2435 = dma.done.wait [#allocation4], 8192  }
 0x2e9   :  { %2436 = vsyncadd [#allocation4], 4294959104 }
 0x2ea   :  { %2437 = dma.done.wait [#allocation7], 8192  }
 0x2eb   :  { %2438 = vsyncadd [#allocation7], 4294959104 }
 0x2ec   :  { %1738 = vsyncpa [#allocation3], 1 }
 0x2ed   :  { %1739 = vsyncpa [#allocation4], 1 }
 0x2ee   :  { %1740 = vsyncpa [#allocation7], 1 }

</bundles_post_ra>
